<compile_context>
chip_gen: v5e
topology: v5e:2x2
jax: 0.10.0
libtpu: 0.0.40
codegen_flags: <defaults>
</compile_context>

<pallas_src>
import functools

import jax
import jax.numpy as jnp
from jax import lax
from jax.experimental import pallas as pl
from jax.experimental.pallas import tpu as pltpu
import numpy as np


# ----------------------------------------------------------------------------
# Fused kernel: stacked bidirectional LSTM, whole sequence, one pallas_call.
#
# Ref layout (all whole-array VMEM, no grid):
#   x_ref                : (T*B, E)      time-major input, row = t*B + b
#   per layer l:
#     wih_ref_l          : (I_l, 8E)     input->gates, both dirs, interleaved
#     whh_ref_l          : (2E, 8E)      hidden->gates, block-diagonal fwd/bwd
#     b_ref_l            : (1, 8E)       b_ih + b_hh, both dirs, interleaved
#   out_ref              : (T*B, 2E)     final layer output [h_fwd | h_bwd]
#
# Gate column order (E-lane blocks): i_f i_b f_f f_b g_f g_b o_f o_b
# (PyTorch gate order i,f,g,o; fwd columns are the even blocks).
# ----------------------------------------------------------------------------
def _make_bilstm_kernel(T, B, E, num_layers):
    G = 8 * E  # fused gate width: 4 gates x 2 directions

    def kernel(x_ref, *refs):
        w_refs = refs[:3 * num_layers]
        out_ref = refs[3 * num_layers]

        # Forward-direction gate columns are the even E-lane blocks.
        gate_lane = lax.broadcasted_iota(jnp.int32, (B, G), 1)
        gate_fwd = (gate_lane % (2 * E)) < E
        # Output layout: first E lanes = forward half, last E lanes = backward.
        out_lane = lax.broadcasted_iota(jnp.int32, (B, 2 * E), 1)
        out_fwd = out_lane < E

        def run_layer(x2d, wih_ref, whh_ref, b_ref):
            # Hoisted input projection: one matmul for the whole sequence and
            # both directions (instead of 2*T tiny matmuls on the t-chain).
            xp = jnp.dot(x2d, wih_ref[...],
                         preferred_element_type=jnp.float32)        # (T*B, 8E)
            whh = whh_ref[...]                                       # (2E, 8E)
            bias = b_ref[...]                                        # (1, 8E)

            h = jnp.zeros((B, 2 * E), jnp.float32)                   # [h_f | h_b]
            c = jnp.zeros((B, 2 * E), jnp.float32)                   # [c_f | c_b]

            hs = []
            # Fully unrolled recurrent loop; h/c carried in registers.
            for t in range(T):
                xa = xp[t * B:(t + 1) * B, :]                # x(t) projection
                xb = xp[(T - 1 - t) * B:(T - t) * B, :]      # x(T-1-t) projection
                gx = jnp.where(gate_fwd, xa, xb)             # fwd lanes: t, bwd: T-1-t
                gates = gx + jnp.dot(h, whh,
                                     preferred_element_type=jnp.float32) + bias
                i_g = jax.nn.sigmoid(gates[:, 0 * 2 * E:1 * 2 * E])
                f_g = jax.nn.sigmoid(gates[:, 1 * 2 * E:2 * 2 * E])
                g_g = jnp.tanh(gates[:, 2 * 2 * E:3 * 2 * E])
                o_g = jax.nn.sigmoid(gates[:, 3 * 2 * E:4 * 2 * E])
                c = f_g * c + i_g * g_g
                h = o_g * jnp.tanh(c)
                hs.append(h)

            # Re-time-align: output time t = [fwd h from step t | bwd h from
            # step T-1-t]; assembled in registers, stored in one shot.
            outs = [jnp.where(out_fwd, hs[t], hs[T - 1 - t]) for t in range(T)]
            return jnp.concatenate(outs, axis=0)                     # (T*B, 2E)

        cur = x_ref[...]                                             # (T*B, E)
        for layer in range(num_layers):
            wih_ref, whh_ref, b_ref = w_refs[3 * layer:3 * layer + 3]
            cur = run_layer(cur, wih_ref, whh_ref, b_ref)
        out_ref[...] = cur                                           # single full store

    return kernel


# ----------------------------------------------------------------------------
# Host-side weight packing into the fused / interleaved layout.
# PyTorch shapes: w_ih (4E, I), w_hh (4E, E), b_* (4E,), gate order [i,f,g,o].
# ----------------------------------------------------------------------------
def _pack_layer(params_fwd, params_bwd, E):
    w_ih_f, w_hh_f, b_ih_f, b_hh_f = params_fwd
    w_ih_b, w_hh_b, b_ih_b, b_hh_b = params_bwd
    zeros = jnp.zeros((E, E), jnp.float32)
    wih_cols, whh_cols, b_cols = [], [], []
    for k in range(4):
        sl = slice(k * E, (k + 1) * E)
        wih_cols += [w_ih_f[sl].T, w_ih_b[sl].T]
        whh_cols += [jnp.concatenate([w_hh_f[sl].T, zeros], axis=0),
                     jnp.concatenate([zeros, w_hh_b[sl].T], axis=0)]
        b_cols += [b_ih_f[sl] + b_hh_f[sl], b_ih_b[sl] + b_hh_b[sl]]
    wih_cat = jnp.concatenate(wih_cols, axis=1)          # (I, 8E)
    whh_blk = jnp.concatenate(whh_cols, axis=1)          # (2E, 8E)
    b_cat = jnp.concatenate(b_cols).reshape(1, 8 * E)    # (1, 8E)
    return wih_cat, whh_blk, b_cat


# ----------------------------------------------------------------------------
# RNNModel.forward equivalent (stacked bidirectional LSTM) via ONE pallas_call.
# ----------------------------------------------------------------------------
def rnn_model_forward(x, params, num_layers, bidirectional):
    """x: (B, T, E) batch-first. Returns (B, T, 2E)."""
    assert bidirectional, "kernel specialized for the bidirectional config"
    B, T, E = x.shape
    x2d = jnp.transpose(x, (1, 0, 2)).reshape(T * B, E)   # row = t*B + b

    flat_w = []
    for layer in range(num_layers):
        flat_w += list(_pack_layer(params[(layer, 0)], params[(layer, 1)], E))

    kernel = _make_bilstm_kernel(T, B, E, num_layers)
    vmem = pl.BlockSpec(memory_space=pltpu.MemorySpace.VMEM)
    out2d = pl.pallas_call(
        kernel,
        out_shape=jax.ShapeDtypeStruct((T * B, 2 * E), jnp.float32),
        in_specs=[vmem] * (1 + 3 * num_layers),
        out_specs=vmem,
    )(x2d, *flat_w)
    return jnp.transpose(out2d.reshape(T, B, 2 * E), (1, 0, 2))


# ----------------------------------------------------------------------------
# Pure-JAX reference (mirrors torch.nn.LSTM semantics) for verification.
# ----------------------------------------------------------------------------
def _lstm_layer_ref(x_tm, w_ih, w_hh, b_ih, b_hh):
    T, B, _ = x_tm.shape
    E = w_hh.shape[1]

    def step(carry, x_t):
        h, c = carry
        gates = x_t @ w_ih.T + b_ih + h @ w_hh.T + b_hh
        i, f, g, o = jnp.split(gates, 4, axis=-1)
        i = jax.nn.sigmoid(i)
        f = jax.nn.sigmoid(f)
        g = jnp.tanh(g)
        o = jax.nn.sigmoid(o)
        c = f * c + i * g
        h = o * jnp.tanh(c)
        return (h, c), h

    init = (jnp.zeros((B, E), jnp.float32), jnp.zeros((B, E), jnp.float32))
    _, ys = lax.scan(step, init, x_tm)
    return ys


def rnn_model_forward_ref(x, params, num_layers, bidirectional):
    num_dir = 2 if bidirectional else 1
    inp = jnp.transpose(x, (1, 0, 2))
    for layer in range(num_layers):
        dir_outs = []
        for d in range(num_dir):
            w_ih, w_hh, b_ih, b_hh = params[(layer, d)]
            xd = inp if d == 0 else inp[::-1]
            out = _lstm_layer_ref(xd, w_ih, w_hh, b_ih, b_hh)
            if d == 1:
                out = out[::-1]
            dir_outs.append(out)
        inp = dir_outs[0] if num_dir == 1 else jnp.concatenate(dir_outs, axis=-1)
    return jnp.transpose(inp, (1, 0, 2))


# ----------------------------------------------------------------------------
# Deterministic parameter init (nn.LSTM shapes: uniform(-k, k), k=1/sqrt(E)).
# ----------------------------------------------------------------------------
def init_lstm_params(key, emb_size, num_layers, bidirectional):
    num_dir = 2 if bidirectional else 1
    k = 1.0 / np.sqrt(emb_size)
    params = {}
    for layer in range(num_layers):
        in_dim = emb_size if layer == 0 else emb_size * num_dir
        for d in range(num_dir):
            key, k1, k2, k3, k4 = jax.random.split(key, 5)
            params[(layer, d)] = (
                jax.random.uniform(k1, (4 * emb_size, in_dim), jnp.float32, -k, k),
                jax.random.uniform(k2, (4 * emb_size, emb_size), jnp.float32, -k, k),
                jax.random.uniform(k3, (4 * emb_size,), jnp.float32, -k, k),
                jax.random.uniform(k4, (4 * emb_size,), jnp.float32, -k, k),
            )
    return params


if __name__ == "__main__":
    BATCH, SEQ, EMB = 2, 8, 32
    NUM_LAYERS = 2
    BIDIRECTIONAL = True

    key = jax.random.PRNGKey(0)
    key, xkey = jax.random.split(key)
    x = jax.random.normal(xkey, (BATCH, SEQ, EMB), jnp.float32)

    params = init_lstm_params(key, EMB, NUM_LAYERS, BIDIRECTIONAL)

    fwd = jax.jit(functools.partial(rnn_model_forward,
                                    num_layers=NUM_LAYERS,
                                    bidirectional=BIDIRECTIONAL))
    out = jax.block_until_ready(fwd(x, params))

    ref = jax.block_until_ready(
        rnn_model_forward_ref(x, params, NUM_LAYERS, BIDIRECTIONAL))

    assert out.shape == (BATCH, SEQ, EMB * (2 if BIDIRECTIONAL else 1)), out.shape
    np.testing.assert_allclose(np.asarray(out), np.asarray(ref), rtol=5e-5, atol=5e-5)

    print("KERNEL_OK")
</pallas_src>

<mosaic_0001>
module attributes {stable_mosaic.version = 11 : i64} {
  func.func @kernel(%arg0: memref<16x32xf32, #tpu.memory_space<vmem>>, %arg1: memref<32x256xf32, #tpu.memory_space<vmem>>, %arg2: memref<64x256xf32, #tpu.memory_space<vmem>>, %arg3: memref<1x256xf32, #tpu.memory_space<vmem>>, %arg4: memref<64x256xf32, #tpu.memory_space<vmem>>, %arg5: memref<64x256xf32, #tpu.memory_space<vmem>>, %arg6: memref<1x256xf32, #tpu.memory_space<vmem>>, %arg7: memref<16x64xf32, #tpu.memory_space<vmem>>) attributes {dimension_semantics = [], scalar_prefetch = 0 : i64, scratch_operands = 0 : i64, tpu.core_type = #tpu.core_type<tc>} {
    %0 = tpu.iota {dimensions = array<i32: 1>} : vector<2x256xi32>
    %c64_i32 = arith.constant 64 : i32
    %c0_i32 = arith.constant 0 : i32
    %1 = arith.cmpi eq, %c64_i32, %c0_i32 : i32
    %c1_i32 = arith.constant 1 : i32
    %2 = arith.select %1, %c1_i32, %c64_i32 : i32
    %3 = vector.broadcast %2 : i32 to vector<2x256xi32>
    %4 = arith.remsi %0, %3 : vector<2x256xi32>
    %c0_i32_0 = arith.constant 0 : i32
    %5 = vector.broadcast %c0_i32_0 : i32 to vector<2x256xi32>
    %6 = arith.cmpi ne, %4, %5 : vector<2x256xi32>
    %c0_i32_1 = arith.constant 0 : i32
    %7 = vector.broadcast %c0_i32_1 : i32 to vector<2x256xi32>
    %8 = arith.cmpi slt, %4, %7 : vector<2x256xi32>
    %c0_i32_2 = arith.constant 0 : i32
    %9 = arith.cmpi slt, %2, %c0_i32_2 : i32
    %10 = vector.broadcast %9 : i1 to vector<2x256xi1>
    %11 = vector.broadcast %10 : vector<2x256xi1> to vector<2x256xi1>
    %12 = arith.xori %8, %11 : vector<2x256xi1>
    %13 = arith.andi %12, %6 : vector<2x256xi1>
    %14 = vector.broadcast %2 : i32 to vector<2x256xi32>
    %15 = arith.addi %4, %14 : vector<2x256xi32>
    %16 = arith.select %13, %15, %4 : vector<2x256xi1>, vector<2x256xi32>
    %c32_i32 = arith.constant 32 : i32
    %17 = vector.broadcast %c32_i32 : i32 to vector<2x256xi32>
    %18 = arith.cmpi slt, %16, %17 : vector<2x256xi32>
    %19 = tpu.iota {dimensions = array<i32: 1>} : vector<2x64xi32>
    %c32_i32_3 = arith.constant 32 : i32
    %20 = vector.broadcast %c32_i32_3 : i32 to vector<2x64xi32>
    %21 = arith.cmpi slt, %19, %20 : vector<2x64xi32>
    %c0 = arith.constant 0 : index
    %c0_4 = arith.constant 0 : index
    %22 = vector.load %arg0[%c0, %c0_4] : memref<16x32xf32, #tpu.memory_space<vmem>>, vector<16x32xf32>
    %c0_5 = arith.constant 0 : index
    %c0_6 = arith.constant 0 : index
    %23 = vector.load %arg1[%c0_5, %c0_6] : memref<32x256xf32, #tpu.memory_space<vmem>>, vector<32x256xf32>
    %cst = arith.constant dense<0.000000e+00> : vector<16x256xf32>
    %24 = tpu.matmul %22, %23, %cst {dimension_numbers = #tpu.dot_dimension_numbers<[1], [0], [0], [1], [0, 0, 1, 1], [], []>} : vector<16x32xf32>, vector<32x256xf32>, vector<16x256xf32> -> vector<16x256xf32>
    %c0_7 = arith.constant 0 : index
    %c0_8 = arith.constant 0 : index
    %25 = vector.load %arg2[%c0_7, %c0_8] : memref<64x256xf32, #tpu.memory_space<vmem>>, vector<64x256xf32>
    %c0_9 = arith.constant 0 : index
    %c0_10 = arith.constant 0 : index
    %26 = vector.load %arg3[%c0_9, %c0_10] : memref<1x256xf32, #tpu.memory_space<vmem>>, vector<1x256xf32>
    %cst_11 = arith.constant 0.000000e+00 : f32
    %27 = vector.broadcast %cst_11 : f32 to vector<2x64xf32>
    %cst_12 = arith.constant 0.000000e+00 : f32
    %28 = vector.broadcast %cst_12 : f32 to vector<2x64xf32>
    %29 = vector.extract_strided_slice %24 {offsets = [0, 0], sizes = [2, 256], strides = [1, 1]} : vector<16x256xf32> to vector<2x256xf32>
    %30 = vector.extract_strided_slice %24 {offsets = [14, 0], sizes = [2, 256], strides = [1, 1]} : vector<16x256xf32> to vector<2x256xf32>
    %31 = arith.select %18, %29, %30 : vector<2x256xi1>, vector<2x256xf32>
    %cst_13 = arith.constant dense<0.000000e+00> : vector<2x256xf32>
    %32 = tpu.matmul %27, %25, %cst_13 {dimension_numbers = #tpu.dot_dimension_numbers<[1], [0], [0], [1], [0, 0, 1, 1], [], []>} : vector<2x64xf32>, vector<64x256xf32>, vector<2x256xf32> -> vector<2x256xf32>
    %33 = arith.addf %31, %32 : vector<2x256xf32>
    %34 = vector.broadcast %26 : vector<1x256xf32> to vector<2x256xf32>
    %35 = arith.addf %33, %34 : vector<2x256xf32>
    %36 = vector.extract_strided_slice %35 {offsets = [0, 0], sizes = [2, 64], strides = [1, 1]} : vector<2x256xf32> to vector<2x64xf32>
    %37 = arith.negf %36 : vector<2x64xf32>
    %38 = math.exp %37 : vector<2x64xf32>
    %cst_14 = arith.constant 1.000000e+00 : f32
    %39 = vector.broadcast %cst_14 : f32 to vector<2x64xf32>
    %40 = arith.addf %39, %38 : vector<2x64xf32>
    %41 = arith.divf %39, %40 : vector<2x64xf32>
    %42 = vector.extract_strided_slice %35 {offsets = [0, 64], sizes = [2, 64], strides = [1, 1]} : vector<2x256xf32> to vector<2x64xf32>
    %43 = arith.negf %42 : vector<2x64xf32>
    %44 = math.exp %43 : vector<2x64xf32>
    %cst_15 = arith.constant 1.000000e+00 : f32
    %45 = vector.broadcast %cst_15 : f32 to vector<2x64xf32>
    %46 = arith.addf %45, %44 : vector<2x64xf32>
    %47 = arith.divf %45, %46 : vector<2x64xf32>
    %48 = vector.extract_strided_slice %35 {offsets = [0, 128], sizes = [2, 64], strides = [1, 1]} : vector<2x256xf32> to vector<2x64xf32>
    %49 = math.tanh %48 : vector<2x64xf32>
    %50 = vector.extract_strided_slice %35 {offsets = [0, 192], sizes = [2, 64], strides = [1, 1]} : vector<2x256xf32> to vector<2x64xf32>
    %51 = arith.negf %50 : vector<2x64xf32>
    %52 = math.exp %51 : vector<2x64xf32>
    %cst_16 = arith.constant 1.000000e+00 : f32
    %53 = vector.broadcast %cst_16 : f32 to vector<2x64xf32>
    %54 = arith.addf %53, %52 : vector<2x64xf32>
    %55 = arith.divf %53, %54 : vector<2x64xf32>
    %56 = arith.mulf %47, %28 : vector<2x64xf32>
    %57 = arith.mulf %41, %49 : vector<2x64xf32>
    %58 = arith.addf %56, %57 : vector<2x64xf32>
    %59 = math.tanh %58 : vector<2x64xf32>
    %60 = arith.mulf %55, %59 : vector<2x64xf32>
    %61 = vector.extract_strided_slice %24 {offsets = [2, 0], sizes = [2, 256], strides = [1, 1]} : vector<16x256xf32> to vector<2x256xf32>
    %62 = vector.extract_strided_slice %24 {offsets = [12, 0], sizes = [2, 256], strides = [1, 1]} : vector<16x256xf32> to vector<2x256xf32>
    %63 = arith.select %18, %61, %62 : vector<2x256xi1>, vector<2x256xf32>
    %cst_17 = arith.constant dense<0.000000e+00> : vector<2x256xf32>
    %64 = tpu.matmul %60, %25, %cst_17 {dimension_numbers = #tpu.dot_dimension_numbers<[1], [0], [0], [1], [0, 0, 1, 1], [], []>} : vector<2x64xf32>, vector<64x256xf32>, vector<2x256xf32> -> vector<2x256xf32>
    %65 = arith.addf %63, %64 : vector<2x256xf32>
    %66 = vector.broadcast %26 : vector<1x256xf32> to vector<2x256xf32>
    %67 = arith.addf %65, %66 : vector<2x256xf32>
    %68 = vector.extract_strided_slice %67 {offsets = [0, 0], sizes = [2, 64], strides = [1, 1]} : vector<2x256xf32> to vector<2x64xf32>
    %69 = arith.negf %68 : vector<2x64xf32>
    %70 = math.exp %69 : vector<2x64xf32>
    %cst_18 = arith.constant 1.000000e+00 : f32
    %71 = vector.broadcast %cst_18 : f32 to vector<2x64xf32>
    %72 = arith.addf %71, %70 : vector<2x64xf32>
    %73 = arith.divf %71, %72 : vector<2x64xf32>
    %74 = vector.extract_strided_slice %67 {offsets = [0, 64], sizes = [2, 64], strides = [1, 1]} : vector<2x256xf32> to vector<2x64xf32>
    %75 = arith.negf %74 : vector<2x64xf32>
    %76 = math.exp %75 : vector<2x64xf32>
    %cst_19 = arith.constant 1.000000e+00 : f32
    %77 = vector.broadcast %cst_19 : f32 to vector<2x64xf32>
    %78 = arith.addf %77, %76 : vector<2x64xf32>
    %79 = arith.divf %77, %78 : vector<2x64xf32>
    %80 = vector.extract_strided_slice %67 {offsets = [0, 128], sizes = [2, 64], strides = [1, 1]} : vector<2x256xf32> to vector<2x64xf32>
    %81 = math.tanh %80 : vector<2x64xf32>
    %82 = vector.extract_strided_slice %67 {offsets = [0, 192], sizes = [2, 64], strides = [1, 1]} : vector<2x256xf32> to vector<2x64xf32>
    %83 = arith.negf %82 : vector<2x64xf32>
    %84 = math.exp %83 : vector<2x64xf32>
    %cst_20 = arith.constant 1.000000e+00 : f32
    %85 = vector.broadcast %cst_20 : f32 to vector<2x64xf32>
    %86 = arith.addf %85, %84 : vector<2x64xf32>
    %87 = arith.divf %85, %86 : vector<2x64xf32>
    %88 = arith.mulf %79, %58 : vector<2x64xf32>
    %89 = arith.mulf %73, %81 : vector<2x64xf32>
    %90 = arith.addf %88, %89 : vector<2x64xf32>
    %91 = math.tanh %90 : vector<2x64xf32>
    %92 = arith.mulf %87, %91 : vector<2x64xf32>
    %93 = vector.extract_strided_slice %24 {offsets = [4, 0], sizes = [2, 256], strides = [1, 1]} : vector<16x256xf32> to vector<2x256xf32>
    %94 = vector.extract_strided_slice %24 {offsets = [10, 0], sizes = [2, 256], strides = [1, 1]} : vector<16x256xf32> to vector<2x256xf32>
    %95 = arith.select %18, %93, %94 : vector<2x256xi1>, vector<2x256xf32>
    %cst_21 = arith.constant dense<0.000000e+00> : vector<2x256xf32>
    %96 = tpu.matmul %92, %25, %cst_21 {dimension_numbers = #tpu.dot_dimension_numbers<[1], [0], [0], [1], [0, 0, 1, 1], [], []>} : vector<2x64xf32>, vector<64x256xf32>, vector<2x256xf32> -> vector<2x256xf32>
    %97 = arith.addf %95, %96 : vector<2x256xf32>
    %98 = vector.broadcast %26 : vector<1x256xf32> to vector<2x256xf32>
    %99 = arith.addf %97, %98 : vector<2x256xf32>
    %100 = vector.extract_strided_slice %99 {offsets = [0, 0], sizes = [2, 64], strides = [1, 1]} : vector<2x256xf32> to vector<2x64xf32>
    %101 = arith.negf %100 : vector<2x64xf32>
    %102 = math.exp %101 : vector<2x64xf32>
    %cst_22 = arith.constant 1.000000e+00 : f32
    %103 = vector.broadcast %cst_22 : f32 to vector<2x64xf32>
    %104 = arith.addf %103, %102 : vector<2x64xf32>
    %105 = arith.divf %103, %104 : vector<2x64xf32>
    %106 = vector.extract_strided_slice %99 {offsets = [0, 64], sizes = [2, 64], strides = [1, 1]} : vector<2x256xf32> to vector<2x64xf32>
    %107 = arith.negf %106 : vector<2x64xf32>
    %108 = math.exp %107 : vector<2x64xf32>
    %cst_23 = arith.constant 1.000000e+00 : f32
    %109 = vector.broadcast %cst_23 : f32 to vector<2x64xf32>
    %110 = arith.addf %109, %108 : vector<2x64xf32>
    %111 = arith.divf %109, %110 : vector<2x64xf32>
    %112 = vector.extract_strided_slice %99 {offsets = [0, 128], sizes = [2, 64], strides = [1, 1]} : vector<2x256xf32> to vector<2x64xf32>
    %113 = math.tanh %112 : vector<2x64xf32>
    %114 = vector.extract_strided_slice %99 {offsets = [0, 192], sizes = [2, 64], strides = [1, 1]} : vector<2x256xf32> to vector<2x64xf32>
    %115 = arith.negf %114 : vector<2x64xf32>
    %116 = math.exp %115 : vector<2x64xf32>
    %cst_24 = arith.constant 1.000000e+00 : f32
    %117 = vector.broadcast %cst_24 : f32 to vector<2x64xf32>
    %118 = arith.addf %117, %116 : vector<2x64xf32>
    %119 = arith.divf %117, %118 : vector<2x64xf32>
    %120 = arith.mulf %111, %90 : vector<2x64xf32>
    %121 = arith.mulf %105, %113 : vector<2x64xf32>
    %122 = arith.addf %120, %121 : vector<2x64xf32>
    %123 = math.tanh %122 : vector<2x64xf32>
    %124 = arith.mulf %119, %123 : vector<2x64xf32>
    %125 = vector.extract_strided_slice %24 {offsets = [6, 0], sizes = [2, 256], strides = [1, 1]} : vector<16x256xf32> to vector<2x256xf32>
    %126 = vector.extract_strided_slice %24 {offsets = [8, 0], sizes = [2, 256], strides = [1, 1]} : vector<16x256xf32> to vector<2x256xf32>
    %127 = arith.select %18, %125, %126 : vector<2x256xi1>, vector<2x256xf32>
    %cst_25 = arith.constant dense<0.000000e+00> : vector<2x256xf32>
    %128 = tpu.matmul %124, %25, %cst_25 {dimension_numbers = #tpu.dot_dimension_numbers<[1], [0], [0], [1], [0, 0, 1, 1], [], []>} : vector<2x64xf32>, vector<64x256xf32>, vector<2x256xf32> -> vector<2x256xf32>
    %129 = arith.addf %127, %128 : vector<2x256xf32>
    %130 = vector.broadcast %26 : vector<1x256xf32> to vector<2x256xf32>
    %131 = arith.addf %129, %130 : vector<2x256xf32>
    %132 = vector.extract_strided_slice %131 {offsets = [0, 0], sizes = [2, 64], strides = [1, 1]} : vector<2x256xf32> to vector<2x64xf32>
    %133 = arith.negf %132 : vector<2x64xf32>
    %134 = math.exp %133 : vector<2x64xf32>
    %cst_26 = arith.constant 1.000000e+00 : f32
    %135 = vector.broadcast %cst_26 : f32 to vector<2x64xf32>
    %136 = arith.addf %135, %134 : vector<2x64xf32>
    %137 = arith.divf %135, %136 : vector<2x64xf32>
    %138 = vector.extract_strided_slice %131 {offsets = [0, 64], sizes = [2, 64], strides = [1, 1]} : vector<2x256xf32> to vector<2x64xf32>
    %139 = arith.negf %138 : vector<2x64xf32>
    %140 = math.exp %139 : vector<2x64xf32>
    %cst_27 = arith.constant 1.000000e+00 : f32
    %141 = vector.broadcast %cst_27 : f32 to vector<2x64xf32>
    %142 = arith.addf %141, %140 : vector<2x64xf32>
    %143 = arith.divf %141, %142 : vector<2x64xf32>
    %144 = vector.extract_strided_slice %131 {offsets = [0, 128], sizes = [2, 64], strides = [1, 1]} : vector<2x256xf32> to vector<2x64xf32>
    %145 = math.tanh %144 : vector<2x64xf32>
    %146 = vector.extract_strided_slice %131 {offsets = [0, 192], sizes = [2, 64], strides = [1, 1]} : vector<2x256xf32> to vector<2x64xf32>
    %147 = arith.negf %146 : vector<2x64xf32>
    %148 = math.exp %147 : vector<2x64xf32>
    %cst_28 = arith.constant 1.000000e+00 : f32
    %149 = vector.broadcast %cst_28 : f32 to vector<2x64xf32>
    %150 = arith.addf %149, %148 : vector<2x64xf32>
    %151 = arith.divf %149, %150 : vector<2x64xf32>
    %152 = arith.mulf %143, %122 : vector<2x64xf32>
    %153 = arith.mulf %137, %145 : vector<2x64xf32>
    %154 = arith.addf %152, %153 : vector<2x64xf32>
    %155 = math.tanh %154 : vector<2x64xf32>
    %156 = arith.mulf %151, %155 : vector<2x64xf32>
    %157 = vector.extract_strided_slice %24 {offsets = [8, 0], sizes = [2, 256], strides = [1, 1]} : vector<16x256xf32> to vector<2x256xf32>
    %158 = vector.extract_strided_slice %24 {offsets = [6, 0], sizes = [2, 256], strides = [1, 1]} : vector<16x256xf32> to vector<2x256xf32>
    %159 = arith.select %18, %157, %158 : vector<2x256xi1>, vector<2x256xf32>
    %cst_29 = arith.constant dense<0.000000e+00> : vector<2x256xf32>
    %160 = tpu.matmul %156, %25, %cst_29 {dimension_numbers = #tpu.dot_dimension_numbers<[1], [0], [0], [1], [0, 0, 1, 1], [], []>} : vector<2x64xf32>, vector<64x256xf32>, vector<2x256xf32> -> vector<2x256xf32>
    %161 = arith.addf %159, %160 : vector<2x256xf32>
    %162 = vector.broadcast %26 : vector<1x256xf32> to vector<2x256xf32>
    %163 = arith.addf %161, %162 : vector<2x256xf32>
    %164 = vector.extract_strided_slice %163 {offsets = [0, 0], sizes = [2, 64], strides = [1, 1]} : vector<2x256xf32> to vector<2x64xf32>
    %165 = arith.negf %164 : vector<2x64xf32>
    %166 = math.exp %165 : vector<2x64xf32>
    %cst_30 = arith.constant 1.000000e+00 : f32
    %167 = vector.broadcast %cst_30 : f32 to vector<2x64xf32>
    %168 = arith.addf %167, %166 : vector<2x64xf32>
    %169 = arith.divf %167, %168 : vector<2x64xf32>
    %170 = vector.extract_strided_slice %163 {offsets = [0, 64], sizes = [2, 64], strides = [1, 1]} : vector<2x256xf32> to vector<2x64xf32>
    %171 = arith.negf %170 : vector<2x64xf32>
    %172 = math.exp %171 : vector<2x64xf32>
    %cst_31 = arith.constant 1.000000e+00 : f32
    %173 = vector.broadcast %cst_31 : f32 to vector<2x64xf32>
    %174 = arith.addf %173, %172 : vector<2x64xf32>
    %175 = arith.divf %173, %174 : vector<2x64xf32>
    %176 = vector.extract_strided_slice %163 {offsets = [0, 128], sizes = [2, 64], strides = [1, 1]} : vector<2x256xf32> to vector<2x64xf32>
    %177 = math.tanh %176 : vector<2x64xf32>
    %178 = vector.extract_strided_slice %163 {offsets = [0, 192], sizes = [2, 64], strides = [1, 1]} : vector<2x256xf32> to vector<2x64xf32>
    %179 = arith.negf %178 : vector<2x64xf32>
    %180 = math.exp %179 : vector<2x64xf32>
    %cst_32 = arith.constant 1.000000e+00 : f32
    %181 = vector.broadcast %cst_32 : f32 to vector<2x64xf32>
    %182 = arith.addf %181, %180 : vector<2x64xf32>
    %183 = arith.divf %181, %182 : vector<2x64xf32>
    %184 = arith.mulf %175, %154 : vector<2x64xf32>
    %185 = arith.mulf %169, %177 : vector<2x64xf32>
    %186 = arith.addf %184, %185 : vector<2x64xf32>
    %187 = math.tanh %186 : vector<2x64xf32>
    %188 = arith.mulf %183, %187 : vector<2x64xf32>
    %189 = vector.extract_strided_slice %24 {offsets = [10, 0], sizes = [2, 256], strides = [1, 1]} : vector<16x256xf32> to vector<2x256xf32>
    %190 = vector.extract_strided_slice %24 {offsets = [4, 0], sizes = [2, 256], strides = [1, 1]} : vector<16x256xf32> to vector<2x256xf32>
    %191 = arith.select %18, %189, %190 : vector<2x256xi1>, vector<2x256xf32>
    %cst_33 = arith.constant dense<0.000000e+00> : vector<2x256xf32>
    %192 = tpu.matmul %188, %25, %cst_33 {dimension_numbers = #tpu.dot_dimension_numbers<[1], [0], [0], [1], [0, 0, 1, 1], [], []>} : vector<2x64xf32>, vector<64x256xf32>, vector<2x256xf32> -> vector<2x256xf32>
    %193 = arith.addf %191, %192 : vector<2x256xf32>
    %194 = vector.broadcast %26 : vector<1x256xf32> to vector<2x256xf32>
    %195 = arith.addf %193, %194 : vector<2x256xf32>
    %196 = vector.extract_strided_slice %195 {offsets = [0, 0], sizes = [2, 64], strides = [1, 1]} : vector<2x256xf32> to vector<2x64xf32>
    %197 = arith.negf %196 : vector<2x64xf32>
    %198 = math.exp %197 : vector<2x64xf32>
    %cst_34 = arith.constant 1.000000e+00 : f32
    %199 = vector.broadcast %cst_34 : f32 to vector<2x64xf32>
    %200 = arith.addf %199, %198 : vector<2x64xf32>
    %201 = arith.divf %199, %200 : vector<2x64xf32>
    %202 = vector.extract_strided_slice %195 {offsets = [0, 64], sizes = [2, 64], strides = [1, 1]} : vector<2x256xf32> to vector<2x64xf32>
    %203 = arith.negf %202 : vector<2x64xf32>
    %204 = math.exp %203 : vector<2x64xf32>
    %cst_35 = arith.constant 1.000000e+00 : f32
    %205 = vector.broadcast %cst_35 : f32 to vector<2x64xf32>
    %206 = arith.addf %205, %204 : vector<2x64xf32>
    %207 = arith.divf %205, %206 : vector<2x64xf32>
    %208 = vector.extract_strided_slice %195 {offsets = [0, 128], sizes = [2, 64], strides = [1, 1]} : vector<2x256xf32> to vector<2x64xf32>
    %209 = math.tanh %208 : vector<2x64xf32>
    %210 = vector.extract_strided_slice %195 {offsets = [0, 192], sizes = [2, 64], strides = [1, 1]} : vector<2x256xf32> to vector<2x64xf32>
    %211 = arith.negf %210 : vector<2x64xf32>
    %212 = math.exp %211 : vector<2x64xf32>
    %cst_36 = arith.constant 1.000000e+00 : f32
    %213 = vector.broadcast %cst_36 : f32 to vector<2x64xf32>
    %214 = arith.addf %213, %212 : vector<2x64xf32>
    %215 = arith.divf %213, %214 : vector<2x64xf32>
    %216 = arith.mulf %207, %186 : vector<2x64xf32>
    %217 = arith.mulf %201, %209 : vector<2x64xf32>
    %218 = arith.addf %216, %217 : vector<2x64xf32>
    %219 = math.tanh %218 : vector<2x64xf32>
    %220 = arith.mulf %215, %219 : vector<2x64xf32>
    %221 = vector.extract_strided_slice %24 {offsets = [12, 0], sizes = [2, 256], strides = [1, 1]} : vector<16x256xf32> to vector<2x256xf32>
    %222 = vector.extract_strided_slice %24 {offsets = [2, 0], sizes = [2, 256], strides = [1, 1]} : vector<16x256xf32> to vector<2x256xf32>
    %223 = arith.select %18, %221, %222 : vector<2x256xi1>, vector<2x256xf32>
    %cst_37 = arith.constant dense<0.000000e+00> : vector<2x256xf32>
    %224 = tpu.matmul %220, %25, %cst_37 {dimension_numbers = #tpu.dot_dimension_numbers<[1], [0], [0], [1], [0, 0, 1, 1], [], []>} : vector<2x64xf32>, vector<64x256xf32>, vector<2x256xf32> -> vector<2x256xf32>
    %225 = arith.addf %223, %224 : vector<2x256xf32>
    %226 = vector.broadcast %26 : vector<1x256xf32> to vector<2x256xf32>
    %227 = arith.addf %225, %226 : vector<2x256xf32>
    %228 = vector.extract_strided_slice %227 {offsets = [0, 0], sizes = [2, 64], strides = [1, 1]} : vector<2x256xf32> to vector<2x64xf32>
    %229 = arith.negf %228 : vector<2x64xf32>
    %230 = math.exp %229 : vector<2x64xf32>
    %cst_38 = arith.constant 1.000000e+00 : f32
    %231 = vector.broadcast %cst_38 : f32 to vector<2x64xf32>
    %232 = arith.addf %231, %230 : vector<2x64xf32>
    %233 = arith.divf %231, %232 : vector<2x64xf32>
    %234 = vector.extract_strided_slice %227 {offsets = [0, 64], sizes = [2, 64], strides = [1, 1]} : vector<2x256xf32> to vector<2x64xf32>
    %235 = arith.negf %234 : vector<2x64xf32>
    %236 = math.exp %235 : vector<2x64xf32>
    %cst_39 = arith.constant 1.000000e+00 : f32
    %237 = vector.broadcast %cst_39 : f32 to vector<2x64xf32>
    %238 = arith.addf %237, %236 : vector<2x64xf32>
    %239 = arith.divf %237, %238 : vector<2x64xf32>
    %240 = vector.extract_strided_slice %227 {offsets = [0, 128], sizes = [2, 64], strides = [1, 1]} : vector<2x256xf32> to vector<2x64xf32>
    %241 = math.tanh %240 : vector<2x64xf32>
    %242 = vector.extract_strided_slice %227 {offsets = [0, 192], sizes = [2, 64], strides = [1, 1]} : vector<2x256xf32> to vector<2x64xf32>
    %243 = arith.negf %242 : vector<2x64xf32>
    %244 = math.exp %243 : vector<2x64xf32>
    %cst_40 = arith.constant 1.000000e+00 : f32
    %245 = vector.broadcast %cst_40 : f32 to vector<2x64xf32>
    %246 = arith.addf %245, %244 : vector<2x64xf32>
    %247 = arith.divf %245, %246 : vector<2x64xf32>
    %248 = arith.mulf %239, %218 : vector<2x64xf32>
    %249 = arith.mulf %233, %241 : vector<2x64xf32>
    %250 = arith.addf %248, %249 : vector<2x64xf32>
    %251 = math.tanh %250 : vector<2x64xf32>
    %252 = arith.mulf %247, %251 : vector<2x64xf32>
    %253 = vector.extract_strided_slice %24 {offsets = [14, 0], sizes = [2, 256], strides = [1, 1]} : vector<16x256xf32> to vector<2x256xf32>
    %254 = vector.extract_strided_slice %24 {offsets = [0, 0], sizes = [2, 256], strides = [1, 1]} : vector<16x256xf32> to vector<2x256xf32>
    %255 = arith.select %18, %253, %254 : vector<2x256xi1>, vector<2x256xf32>
    %cst_41 = arith.constant dense<0.000000e+00> : vector<2x256xf32>
    %256 = tpu.matmul %252, %25, %cst_41 {dimension_numbers = #tpu.dot_dimension_numbers<[1], [0], [0], [1], [0, 0, 1, 1], [], []>} : vector<2x64xf32>, vector<64x256xf32>, vector<2x256xf32> -> vector<2x256xf32>
    %257 = arith.addf %255, %256 : vector<2x256xf32>
    %258 = vector.broadcast %26 : vector<1x256xf32> to vector<2x256xf32>
    %259 = arith.addf %257, %258 : vector<2x256xf32>
    %260 = vector.extract_strided_slice %259 {offsets = [0, 0], sizes = [2, 64], strides = [1, 1]} : vector<2x256xf32> to vector<2x64xf32>
    %261 = arith.negf %260 : vector<2x64xf32>
    %262 = math.exp %261 : vector<2x64xf32>
    %cst_42 = arith.constant 1.000000e+00 : f32
    %263 = vector.broadcast %cst_42 : f32 to vector<2x64xf32>
    %264 = arith.addf %263, %262 : vector<2x64xf32>
    %265 = arith.divf %263, %264 : vector<2x64xf32>
    %266 = vector.extract_strided_slice %259 {offsets = [0, 64], sizes = [2, 64], strides = [1, 1]} : vector<2x256xf32> to vector<2x64xf32>
    %267 = arith.negf %266 : vector<2x64xf32>
    %268 = math.exp %267 : vector<2x64xf32>
    %cst_43 = arith.constant 1.000000e+00 : f32
    %269 = vector.broadcast %cst_43 : f32 to vector<2x64xf32>
    %270 = arith.addf %269, %268 : vector<2x64xf32>
    %271 = arith.divf %269, %270 : vector<2x64xf32>
    %272 = vector.extract_strided_slice %259 {offsets = [0, 128], sizes = [2, 64], strides = [1, 1]} : vector<2x256xf32> to vector<2x64xf32>
    %273 = math.tanh %272 : vector<2x64xf32>
    %274 = vector.extract_strided_slice %259 {offsets = [0, 192], sizes = [2, 64], strides = [1, 1]} : vector<2x256xf32> to vector<2x64xf32>
    %275 = arith.negf %274 : vector<2x64xf32>
    %276 = math.exp %275 : vector<2x64xf32>
    %cst_44 = arith.constant 1.000000e+00 : f32
    %277 = vector.broadcast %cst_44 : f32 to vector<2x64xf32>
    %278 = arith.addf %277, %276 : vector<2x64xf32>
    %279 = arith.divf %277, %278 : vector<2x64xf32>
    %280 = arith.mulf %271, %250 : vector<2x64xf32>
    %281 = arith.mulf %265, %273 : vector<2x64xf32>
    %282 = arith.addf %280, %281 : vector<2x64xf32>
    %283 = math.tanh %282 : vector<2x64xf32>
    %284 = arith.mulf %279, %283 : vector<2x64xf32>
    %285 = arith.select %21, %60, %284 : vector<2x64xi1>, vector<2x64xf32>
    %286 = arith.select %21, %92, %252 : vector<2x64xi1>, vector<2x64xf32>
    %287 = arith.select %21, %124, %220 : vector<2x64xi1>, vector<2x64xf32>
    %288 = arith.select %21, %156, %188 : vector<2x64xi1>, vector<2x64xf32>
    %289 = arith.select %21, %188, %156 : vector<2x64xi1>, vector<2x64xf32>
    %290 = arith.select %21, %220, %124 : vector<2x64xi1>, vector<2x64xf32>
    %291 = arith.select %21, %252, %92 : vector<2x64xi1>, vector<2x64xf32>
    %292 = arith.select %21, %284, %60 : vector<2x64xi1>, vector<2x64xf32>
    %293 = tpu.concatenate %285, %286, %287, %288, %289, %290, %291, %292 in 0 : vector<2x64xf32>, vector<2x64xf32>, vector<2x64xf32>, vector<2x64xf32>, vector<2x64xf32>, vector<2x64xf32>, vector<2x64xf32>, vector<2x64xf32> -> vector<16x64xf32>
    %c0_45 = arith.constant 0 : index
    %c0_46 = arith.constant 0 : index
    %294 = vector.load %arg4[%c0_45, %c0_46] : memref<64x256xf32, #tpu.memory_space<vmem>>, vector<64x256xf32>
    %cst_47 = arith.constant dense<0.000000e+00> : vector<16x256xf32>
    %295 = tpu.matmul %293, %294, %cst_47 {dimension_numbers = #tpu.dot_dimension_numbers<[1], [0], [0], [1], [0, 0, 1, 1], [], []>} : vector<16x64xf32>, vector<64x256xf32>, vector<16x256xf32> -> vector<16x256xf32>
    %c0_48 = arith.constant 0 : index
    %c0_49 = arith.constant 0 : index
    %296 = vector.load %arg5[%c0_48, %c0_49] : memref<64x256xf32, #tpu.memory_space<vmem>>, vector<64x256xf32>
    %c0_50 = arith.constant 0 : index
    %c0_51 = arith.constant 0 : index
    %297 = vector.load %arg6[%c0_50, %c0_51] : memref<1x256xf32, #tpu.memory_space<vmem>>, vector<1x256xf32>
    %cst_52 = arith.constant 0.000000e+00 : f32
    %298 = vector.broadcast %cst_52 : f32 to vector<2x64xf32>
    %cst_53 = arith.constant 0.000000e+00 : f32
    %299 = vector.broadcast %cst_53 : f32 to vector<2x64xf32>
    %300 = vector.extract_strided_slice %295 {offsets = [0, 0], sizes = [2, 256], strides = [1, 1]} : vector<16x256xf32> to vector<2x256xf32>
    %301 = vector.extract_strided_slice %295 {offsets = [14, 0], sizes = [2, 256], strides = [1, 1]} : vector<16x256xf32> to vector<2x256xf32>
    %302 = arith.select %18, %300, %301 : vector<2x256xi1>, vector<2x256xf32>
    %cst_54 = arith.constant dense<0.000000e+00> : vector<2x256xf32>
    %303 = tpu.matmul %298, %296, %cst_54 {dimension_numbers = #tpu.dot_dimension_numbers<[1], [0], [0], [1], [0, 0, 1, 1], [], []>} : vector<2x64xf32>, vector<64x256xf32>, vector<2x256xf32> -> vector<2x256xf32>
    %304 = arith.addf %302, %303 : vector<2x256xf32>
    %305 = vector.broadcast %297 : vector<1x256xf32> to vector<2x256xf32>
    %306 = arith.addf %304, %305 : vector<2x256xf32>
    %307 = vector.extract_strided_slice %306 {offsets = [0, 0], sizes = [2, 64], strides = [1, 1]} : vector<2x256xf32> to vector<2x64xf32>
    %308 = arith.negf %307 : vector<2x64xf32>
    %309 = math.exp %308 : vector<2x64xf32>
    %cst_55 = arith.constant 1.000000e+00 : f32
    %310 = vector.broadcast %cst_55 : f32 to vector<2x64xf32>
    %311 = arith.addf %310, %309 : vector<2x64xf32>
    %312 = arith.divf %310, %311 : vector<2x64xf32>
    %313 = vector.extract_strided_slice %306 {offsets = [0, 64], sizes = [2, 64], strides = [1, 1]} : vector<2x256xf32> to vector<2x64xf32>
    %314 = arith.negf %313 : vector<2x64xf32>
    %315 = math.exp %314 : vector<2x64xf32>
    %cst_56 = arith.constant 1.000000e+00 : f32
    %316 = vector.broadcast %cst_56 : f32 to vector<2x64xf32>
    %317 = arith.addf %316, %315 : vector<2x64xf32>
    %318 = arith.divf %316, %317 : vector<2x64xf32>
    %319 = vector.extract_strided_slice %306 {offsets = [0, 128], sizes = [2, 64], strides = [1, 1]} : vector<2x256xf32> to vector<2x64xf32>
    %320 = math.tanh %319 : vector<2x64xf32>
    %321 = vector.extract_strided_slice %306 {offsets = [0, 192], sizes = [2, 64], strides = [1, 1]} : vector<2x256xf32> to vector<2x64xf32>
    %322 = arith.negf %321 : vector<2x64xf32>
    %323 = math.exp %322 : vector<2x64xf32>
    %cst_57 = arith.constant 1.000000e+00 : f32
    %324 = vector.broadcast %cst_57 : f32 to vector<2x64xf32>
    %325 = arith.addf %324, %323 : vector<2x64xf32>
    %326 = arith.divf %324, %325 : vector<2x64xf32>
    %327 = arith.mulf %318, %299 : vector<2x64xf32>
    %328 = arith.mulf %312, %320 : vector<2x64xf32>
    %329 = arith.addf %327, %328 : vector<2x64xf32>
    %330 = math.tanh %329 : vector<2x64xf32>
    %331 = arith.mulf %326, %330 : vector<2x64xf32>
    %332 = vector.extract_strided_slice %295 {offsets = [2, 0], sizes = [2, 256], strides = [1, 1]} : vector<16x256xf32> to vector<2x256xf32>
    %333 = vector.extract_strided_slice %295 {offsets = [12, 0], sizes = [2, 256], strides = [1, 1]} : vector<16x256xf32> to vector<2x256xf32>
    %334 = arith.select %18, %332, %333 : vector<2x256xi1>, vector<2x256xf32>
    %cst_58 = arith.constant dense<0.000000e+00> : vector<2x256xf32>
    %335 = tpu.matmul %331, %296, %cst_58 {dimension_numbers = #tpu.dot_dimension_numbers<[1], [0], [0], [1], [0, 0, 1, 1], [], []>} : vector<2x64xf32>, vector<64x256xf32>, vector<2x256xf32> -> vector<2x256xf32>
    %336 = arith.addf %334, %335 : vector<2x256xf32>
    %337 = vector.broadcast %297 : vector<1x256xf32> to vector<2x256xf32>
    %338 = arith.addf %336, %337 : vector<2x256xf32>
    %339 = vector.extract_strided_slice %338 {offsets = [0, 0], sizes = [2, 64], strides = [1, 1]} : vector<2x256xf32> to vector<2x64xf32>
    %340 = arith.negf %339 : vector<2x64xf32>
    %341 = math.exp %340 : vector<2x64xf32>
    %cst_59 = arith.constant 1.000000e+00 : f32
    %342 = vector.broadcast %cst_59 : f32 to vector<2x64xf32>
    %343 = arith.addf %342, %341 : vector<2x64xf32>
    %344 = arith.divf %342, %343 : vector<2x64xf32>
    %345 = vector.extract_strided_slice %338 {offsets = [0, 64], sizes = [2, 64], strides = [1, 1]} : vector<2x256xf32> to vector<2x64xf32>
    %346 = arith.negf %345 : vector<2x64xf32>
    %347 = math.exp %346 : vector<2x64xf32>
    %cst_60 = arith.constant 1.000000e+00 : f32
    %348 = vector.broadcast %cst_60 : f32 to vector<2x64xf32>
    %349 = arith.addf %348, %347 : vector<2x64xf32>
    %350 = arith.divf %348, %349 : vector<2x64xf32>
    %351 = vector.extract_strided_slice %338 {offsets = [0, 128], sizes = [2, 64], strides = [1, 1]} : vector<2x256xf32> to vector<2x64xf32>
    %352 = math.tanh %351 : vector<2x64xf32>
    %353 = vector.extract_strided_slice %338 {offsets = [0, 192], sizes = [2, 64], strides = [1, 1]} : vector<2x256xf32> to vector<2x64xf32>
    %354 = arith.negf %353 : vector<2x64xf32>
    %355 = math.exp %354 : vector<2x64xf32>
    %cst_61 = arith.constant 1.000000e+00 : f32
    %356 = vector.broadcast %cst_61 : f32 to vector<2x64xf32>
    %357 = arith.addf %356, %355 : vector<2x64xf32>
    %358 = arith.divf %356, %357 : vector<2x64xf32>
    %359 = arith.mulf %350, %329 : vector<2x64xf32>
    %360 = arith.mulf %344, %352 : vector<2x64xf32>
    %361 = arith.addf %359, %360 : vector<2x64xf32>
    %362 = math.tanh %361 : vector<2x64xf32>
    %363 = arith.mulf %358, %362 : vector<2x64xf32>
    %364 = vector.extract_strided_slice %295 {offsets = [4, 0], sizes = [2, 256], strides = [1, 1]} : vector<16x256xf32> to vector<2x256xf32>
    %365 = vector.extract_strided_slice %295 {offsets = [10, 0], sizes = [2, 256], strides = [1, 1]} : vector<16x256xf32> to vector<2x256xf32>
    %366 = arith.select %18, %364, %365 : vector<2x256xi1>, vector<2x256xf32>
    %cst_62 = arith.constant dense<0.000000e+00> : vector<2x256xf32>
    %367 = tpu.matmul %363, %296, %cst_62 {dimension_numbers = #tpu.dot_dimension_numbers<[1], [0], [0], [1], [0, 0, 1, 1], [], []>} : vector<2x64xf32>, vector<64x256xf32>, vector<2x256xf32> -> vector<2x256xf32>
    %368 = arith.addf %366, %367 : vector<2x256xf32>
    %369 = vector.broadcast %297 : vector<1x256xf32> to vector<2x256xf32>
    %370 = arith.addf %368, %369 : vector<2x256xf32>
    %371 = vector.extract_strided_slice %370 {offsets = [0, 0], sizes = [2, 64], strides = [1, 1]} : vector<2x256xf32> to vector<2x64xf32>
    %372 = arith.negf %371 : vector<2x64xf32>
    %373 = math.exp %372 : vector<2x64xf32>
    %cst_63 = arith.constant 1.000000e+00 : f32
    %374 = vector.broadcast %cst_63 : f32 to vector<2x64xf32>
    %375 = arith.addf %374, %373 : vector<2x64xf32>
    %376 = arith.divf %374, %375 : vector<2x64xf32>
    %377 = vector.extract_strided_slice %370 {offsets = [0, 64], sizes = [2, 64], strides = [1, 1]} : vector<2x256xf32> to vector<2x64xf32>
    %378 = arith.negf %377 : vector<2x64xf32>
    %379 = math.exp %378 : vector<2x64xf32>
    %cst_64 = arith.constant 1.000000e+00 : f32
    %380 = vector.broadcast %cst_64 : f32 to vector<2x64xf32>
    %381 = arith.addf %380, %379 : vector<2x64xf32>
    %382 = arith.divf %380, %381 : vector<2x64xf32>
    %383 = vector.extract_strided_slice %370 {offsets = [0, 128], sizes = [2, 64], strides = [1, 1]} : vector<2x256xf32> to vector<2x64xf32>
    %384 = math.tanh %383 : vector<2x64xf32>
    %385 = vector.extract_strided_slice %370 {offsets = [0, 192], sizes = [2, 64], strides = [1, 1]} : vector<2x256xf32> to vector<2x64xf32>
    %386 = arith.negf %385 : vector<2x64xf32>
    %387 = math.exp %386 : vector<2x64xf32>
    %cst_65 = arith.constant 1.000000e+00 : f32
    %388 = vector.broadcast %cst_65 : f32 to vector<2x64xf32>
    %389 = arith.addf %388, %387 : vector<2x64xf32>
    %390 = arith.divf %388, %389 : vector<2x64xf32>
    %391 = arith.mulf %382, %361 : vector<2x64xf32>
    %392 = arith.mulf %376, %384 : vector<2x64xf32>
    %393 = arith.addf %391, %392 : vector<2x64xf32>
    %394 = math.tanh %393 : vector<2x64xf32>
    %395 = arith.mulf %390, %394 : vector<2x64xf32>
    %396 = vector.extract_strided_slice %295 {offsets = [6, 0], sizes = [2, 256], strides = [1, 1]} : vector<16x256xf32> to vector<2x256xf32>
    %397 = vector.extract_strided_slice %295 {offsets = [8, 0], sizes = [2, 256], strides = [1, 1]} : vector<16x256xf32> to vector<2x256xf32>
    %398 = arith.select %18, %396, %397 : vector<2x256xi1>, vector<2x256xf32>
    %cst_66 = arith.constant dense<0.000000e+00> : vector<2x256xf32>
    %399 = tpu.matmul %395, %296, %cst_66 {dimension_numbers = #tpu.dot_dimension_numbers<[1], [0], [0], [1], [0, 0, 1, 1], [], []>} : vector<2x64xf32>, vector<64x256xf32>, vector<2x256xf32> -> vector<2x256xf32>
    %400 = arith.addf %398, %399 : vector<2x256xf32>
    %401 = vector.broadcast %297 : vector<1x256xf32> to vector<2x256xf32>
    %402 = arith.addf %400, %401 : vector<2x256xf32>
    %403 = vector.extract_strided_slice %402 {offsets = [0, 0], sizes = [2, 64], strides = [1, 1]} : vector<2x256xf32> to vector<2x64xf32>
    %404 = arith.negf %403 : vector<2x64xf32>
    %405 = math.exp %404 : vector<2x64xf32>
    %cst_67 = arith.constant 1.000000e+00 : f32
    %406 = vector.broadcast %cst_67 : f32 to vector<2x64xf32>
    %407 = arith.addf %406, %405 : vector<2x64xf32>
    %408 = arith.divf %406, %407 : vector<2x64xf32>
    %409 = vector.extract_strided_slice %402 {offsets = [0, 64], sizes = [2, 64], strides = [1, 1]} : vector<2x256xf32> to vector<2x64xf32>
    %410 = arith.negf %409 : vector<2x64xf32>
    %411 = math.exp %410 : vector<2x64xf32>
    %cst_68 = arith.constant 1.000000e+00 : f32
    %412 = vector.broadcast %cst_68 : f32 to vector<2x64xf32>
    %413 = arith.addf %412, %411 : vector<2x64xf32>
    %414 = arith.divf %412, %413 : vector<2x64xf32>
    %415 = vector.extract_strided_slice %402 {offsets = [0, 128], sizes = [2, 64], strides = [1, 1]} : vector<2x256xf32> to vector<2x64xf32>
    %416 = math.tanh %415 : vector<2x64xf32>
    %417 = vector.extract_strided_slice %402 {offsets = [0, 192], sizes = [2, 64], strides = [1, 1]} : vector<2x256xf32> to vector<2x64xf32>
    %418 = arith.negf %417 : vector<2x64xf32>
    %419 = math.exp %418 : vector<2x64xf32>
    %cst_69 = arith.constant 1.000000e+00 : f32
    %420 = vector.broadcast %cst_69 : f32 to vector<2x64xf32>
    %421 = arith.addf %420, %419 : vector<2x64xf32>
    %422 = arith.divf %420, %421 : vector<2x64xf32>
    %423 = arith.mulf %414, %393 : vector<2x64xf32>
    %424 = arith.mulf %408, %416 : vector<2x64xf32>
    %425 = arith.addf %423, %424 : vector<2x64xf32>
    %426 = math.tanh %425 : vector<2x64xf32>
    %427 = arith.mulf %422, %426 : vector<2x64xf32>
    %428 = vector.extract_strided_slice %295 {offsets = [8, 0], sizes = [2, 256], strides = [1, 1]} : vector<16x256xf32> to vector<2x256xf32>
    %429 = vector.extract_strided_slice %295 {offsets = [6, 0], sizes = [2, 256], strides = [1, 1]} : vector<16x256xf32> to vector<2x256xf32>
    %430 = arith.select %18, %428, %429 : vector<2x256xi1>, vector<2x256xf32>
    %cst_70 = arith.constant dense<0.000000e+00> : vector<2x256xf32>
    %431 = tpu.matmul %427, %296, %cst_70 {dimension_numbers = #tpu.dot_dimension_numbers<[1], [0], [0], [1], [0, 0, 1, 1], [], []>} : vector<2x64xf32>, vector<64x256xf32>, vector<2x256xf32> -> vector<2x256xf32>
    %432 = arith.addf %430, %431 : vector<2x256xf32>
    %433 = vector.broadcast %297 : vector<1x256xf32> to vector<2x256xf32>
    %434 = arith.addf %432, %433 : vector<2x256xf32>
    %435 = vector.extract_strided_slice %434 {offsets = [0, 0], sizes = [2, 64], strides = [1, 1]} : vector<2x256xf32> to vector<2x64xf32>
    %436 = arith.negf %435 : vector<2x64xf32>
    %437 = math.exp %436 : vector<2x64xf32>
    %cst_71 = arith.constant 1.000000e+00 : f32
    %438 = vector.broadcast %cst_71 : f32 to vector<2x64xf32>
    %439 = arith.addf %438, %437 : vector<2x64xf32>
    %440 = arith.divf %438, %439 : vector<2x64xf32>
    %441 = vector.extract_strided_slice %434 {offsets = [0, 64], sizes = [2, 64], strides = [1, 1]} : vector<2x256xf32> to vector<2x64xf32>
    %442 = arith.negf %441 : vector<2x64xf32>
    %443 = math.exp %442 : vector<2x64xf32>
    %cst_72 = arith.constant 1.000000e+00 : f32
    %444 = vector.broadcast %cst_72 : f32 to vector<2x64xf32>
    %445 = arith.addf %444, %443 : vector<2x64xf32>
    %446 = arith.divf %444, %445 : vector<2x64xf32>
    %447 = vector.extract_strided_slice %434 {offsets = [0, 128], sizes = [2, 64], strides = [1, 1]} : vector<2x256xf32> to vector<2x64xf32>
    %448 = math.tanh %447 : vector<2x64xf32>
    %449 = vector.extract_strided_slice %434 {offsets = [0, 192], sizes = [2, 64], strides = [1, 1]} : vector<2x256xf32> to vector<2x64xf32>
    %450 = arith.negf %449 : vector<2x64xf32>
    %451 = math.exp %450 : vector<2x64xf32>
    %cst_73 = arith.constant 1.000000e+00 : f32
    %452 = vector.broadcast %cst_73 : f32 to vector<2x64xf32>
    %453 = arith.addf %452, %451 : vector<2x64xf32>
    %454 = arith.divf %452, %453 : vector<2x64xf32>
    %455 = arith.mulf %446, %425 : vector<2x64xf32>
    %456 = arith.mulf %440, %448 : vector<2x64xf32>
    %457 = arith.addf %455, %456 : vector<2x64xf32>
    %458 = math.tanh %457 : vector<2x64xf32>
    %459 = arith.mulf %454, %458 : vector<2x64xf32>
    %460 = vector.extract_strided_slice %295 {offsets = [10, 0], sizes = [2, 256], strides = [1, 1]} : vector<16x256xf32> to vector<2x256xf32>
    %461 = vector.extract_strided_slice %295 {offsets = [4, 0], sizes = [2, 256], strides = [1, 1]} : vector<16x256xf32> to vector<2x256xf32>
    %462 = arith.select %18, %460, %461 : vector<2x256xi1>, vector<2x256xf32>
    %cst_74 = arith.constant dense<0.000000e+00> : vector<2x256xf32>
    %463 = tpu.matmul %459, %296, %cst_74 {dimension_numbers = #tpu.dot_dimension_numbers<[1], [0], [0], [1], [0, 0, 1, 1], [], []>} : vector<2x64xf32>, vector<64x256xf32>, vector<2x256xf32> -> vector<2x256xf32>
    %464 = arith.addf %462, %463 : vector<2x256xf32>
    %465 = vector.broadcast %297 : vector<1x256xf32> to vector<2x256xf32>
    %466 = arith.addf %464, %465 : vector<2x256xf32>
    %467 = vector.extract_strided_slice %466 {offsets = [0, 0], sizes = [2, 64], strides = [1, 1]} : vector<2x256xf32> to vector<2x64xf32>
    %468 = arith.negf %467 : vector<2x64xf32>
    %469 = math.exp %468 : vector<2x64xf32>
    %cst_75 = arith.constant 1.000000e+00 : f32
    %470 = vector.broadcast %cst_75 : f32 to vector<2x64xf32>
    %471 = arith.addf %470, %469 : vector<2x64xf32>
    %472 = arith.divf %470, %471 : vector<2x64xf32>
    %473 = vector.extract_strided_slice %466 {offsets = [0, 64], sizes = [2, 64], strides = [1, 1]} : vector<2x256xf32> to vector<2x64xf32>
    %474 = arith.negf %473 : vector<2x64xf32>
    %475 = math.exp %474 : vector<2x64xf32>
    %cst_76 = arith.constant 1.000000e+00 : f32
    %476 = vector.broadcast %cst_76 : f32 to vector<2x64xf32>
    %477 = arith.addf %476, %475 : vector<2x64xf32>
    %478 = arith.divf %476, %477 : vector<2x64xf32>
    %479 = vector.extract_strided_slice %466 {offsets = [0, 128], sizes = [2, 64], strides = [1, 1]} : vector<2x256xf32> to vector<2x64xf32>
    %480 = math.tanh %479 : vector<2x64xf32>
    %481 = vector.extract_strided_slice %466 {offsets = [0, 192], sizes = [2, 64], strides = [1, 1]} : vector<2x256xf32> to vector<2x64xf32>
    %482 = arith.negf %481 : vector<2x64xf32>
    %483 = math.exp %482 : vector<2x64xf32>
    %cst_77 = arith.constant 1.000000e+00 : f32
    %484 = vector.broadcast %cst_77 : f32 to vector<2x64xf32>
    %485 = arith.addf %484, %483 : vector<2x64xf32>
    %486 = arith.divf %484, %485 : vector<2x64xf32>
    %487 = arith.mulf %478, %457 : vector<2x64xf32>
    %488 = arith.mulf %472, %480 : vector<2x64xf32>
    %489 = arith.addf %487, %488 : vector<2x64xf32>
    %490 = math.tanh %489 : vector<2x64xf32>
    %491 = arith.mulf %486, %490 : vector<2x64xf32>
    %492 = vector.extract_strided_slice %295 {offsets = [12, 0], sizes = [2, 256], strides = [1, 1]} : vector<16x256xf32> to vector<2x256xf32>
    %493 = vector.extract_strided_slice %295 {offsets = [2, 0], sizes = [2, 256], strides = [1, 1]} : vector<16x256xf32> to vector<2x256xf32>
    %494 = arith.select %18, %492, %493 : vector<2x256xi1>, vector<2x256xf32>
    %cst_78 = arith.constant dense<0.000000e+00> : vector<2x256xf32>
    %495 = tpu.matmul %491, %296, %cst_78 {dimension_numbers = #tpu.dot_dimension_numbers<[1], [0], [0], [1], [0, 0, 1, 1], [], []>} : vector<2x64xf32>, vector<64x256xf32>, vector<2x256xf32> -> vector<2x256xf32>
    %496 = arith.addf %494, %495 : vector<2x256xf32>
    %497 = vector.broadcast %297 : vector<1x256xf32> to vector<2x256xf32>
    %498 = arith.addf %496, %497 : vector<2x256xf32>
    %499 = vector.extract_strided_slice %498 {offsets = [0, 0], sizes = [2, 64], strides = [1, 1]} : vector<2x256xf32> to vector<2x64xf32>
    %500 = arith.negf %499 : vector<2x64xf32>
    %501 = math.exp %500 : vector<2x64xf32>
    %cst_79 = arith.constant 1.000000e+00 : f32
    %502 = vector.broadcast %cst_79 : f32 to vector<2x64xf32>
    %503 = arith.addf %502, %501 : vector<2x64xf32>
    %504 = arith.divf %502, %503 : vector<2x64xf32>
    %505 = vector.extract_strided_slice %498 {offsets = [0, 64], sizes = [2, 64], strides = [1, 1]} : vector<2x256xf32> to vector<2x64xf32>
    %506 = arith.negf %505 : vector<2x64xf32>
    %507 = math.exp %506 : vector<2x64xf32>
    %cst_80 = arith.constant 1.000000e+00 : f32
    %508 = vector.broadcast %cst_80 : f32 to vector<2x64xf32>
    %509 = arith.addf %508, %507 : vector<2x64xf32>
    %510 = arith.divf %508, %509 : vector<2x64xf32>
    %511 = vector.extract_strided_slice %498 {offsets = [0, 128], sizes = [2, 64], strides = [1, 1]} : vector<2x256xf32> to vector<2x64xf32>
    %512 = math.tanh %511 : vector<2x64xf32>
    %513 = vector.extract_strided_slice %498 {offsets = [0, 192], sizes = [2, 64], strides = [1, 1]} : vector<2x256xf32> to vector<2x64xf32>
    %514 = arith.negf %513 : vector<2x64xf32>
    %515 = math.exp %514 : vector<2x64xf32>
    %cst_81 = arith.constant 1.000000e+00 : f32
    %516 = vector.broadcast %cst_81 : f32 to vector<2x64xf32>
    %517 = arith.addf %516, %515 : vector<2x64xf32>
    %518 = arith.divf %516, %517 : vector<2x64xf32>
    %519 = arith.mulf %510, %489 : vector<2x64xf32>
    %520 = arith.mulf %504, %512 : vector<2x64xf32>
    %521 = arith.addf %519, %520 : vector<2x64xf32>
    %522 = math.tanh %521 : vector<2x64xf32>
    %523 = arith.mulf %518, %522 : vector<2x64xf32>
    %524 = vector.extract_strided_slice %295 {offsets = [14, 0], sizes = [2, 256], strides = [1, 1]} : vector<16x256xf32> to vector<2x256xf32>
    %525 = vector.extract_strided_slice %295 {offsets = [0, 0], sizes = [2, 256], strides = [1, 1]} : vector<16x256xf32> to vector<2x256xf32>
    %526 = arith.select %18, %524, %525 : vector<2x256xi1>, vector<2x256xf32>
    %cst_82 = arith.constant dense<0.000000e+00> : vector<2x256xf32>
    %527 = tpu.matmul %523, %296, %cst_82 {dimension_numbers = #tpu.dot_dimension_numbers<[1], [0], [0], [1], [0, 0, 1, 1], [], []>} : vector<2x64xf32>, vector<64x256xf32>, vector<2x256xf32> -> vector<2x256xf32>
    %528 = arith.addf %526, %527 : vector<2x256xf32>
    %529 = vector.broadcast %297 : vector<1x256xf32> to vector<2x256xf32>
    %530 = arith.addf %528, %529 : vector<2x256xf32>
    %531 = vector.extract_strided_slice %530 {offsets = [0, 0], sizes = [2, 64], strides = [1, 1]} : vector<2x256xf32> to vector<2x64xf32>
    %532 = arith.negf %531 : vector<2x64xf32>
    %533 = math.exp %532 : vector<2x64xf32>
    %cst_83 = arith.constant 1.000000e+00 : f32
    %534 = vector.broadcast %cst_83 : f32 to vector<2x64xf32>
    %535 = arith.addf %534, %533 : vector<2x64xf32>
    %536 = arith.divf %534, %535 : vector<2x64xf32>
    %537 = vector.extract_strided_slice %530 {offsets = [0, 64], sizes = [2, 64], strides = [1, 1]} : vector<2x256xf32> to vector<2x64xf32>
    %538 = arith.negf %537 : vector<2x64xf32>
    %539 = math.exp %538 : vector<2x64xf32>
    %cst_84 = arith.constant 1.000000e+00 : f32
    %540 = vector.broadcast %cst_84 : f32 to vector<2x64xf32>
    %541 = arith.addf %540, %539 : vector<2x64xf32>
    %542 = arith.divf %540, %541 : vector<2x64xf32>
    %543 = vector.extract_strided_slice %530 {offsets = [0, 128], sizes = [2, 64], strides = [1, 1]} : vector<2x256xf32> to vector<2x64xf32>
    %544 = math.tanh %543 : vector<2x64xf32>
    %545 = vector.extract_strided_slice %530 {offsets = [0, 192], sizes = [2, 64], strides = [1, 1]} : vector<2x256xf32> to vector<2x64xf32>
    %546 = arith.negf %545 : vector<2x64xf32>
    %547 = math.exp %546 : vector<2x64xf32>
    %cst_85 = arith.constant 1.000000e+00 : f32
    %548 = vector.broadcast %cst_85 : f32 to vector<2x64xf32>
    %549 = arith.addf %548, %547 : vector<2x64xf32>
    %550 = arith.divf %548, %549 : vector<2x64xf32>
    %551 = arith.mulf %542, %521 : vector<2x64xf32>
    %552 = arith.mulf %536, %544 : vector<2x64xf32>
    %553 = arith.addf %551, %552 : vector<2x64xf32>
    %554 = math.tanh %553 : vector<2x64xf32>
    %555 = arith.mulf %550, %554 : vector<2x64xf32>
    %556 = arith.select %21, %331, %555 : vector<2x64xi1>, vector<2x64xf32>
    %557 = arith.select %21, %363, %523 : vector<2x64xi1>, vector<2x64xf32>
    %558 = arith.select %21, %395, %491 : vector<2x64xi1>, vector<2x64xf32>
    %559 = arith.select %21, %427, %459 : vector<2x64xi1>, vector<2x64xf32>
    %560 = arith.select %21, %459, %427 : vector<2x64xi1>, vector<2x64xf32>
    %561 = arith.select %21, %491, %395 : vector<2x64xi1>, vector<2x64xf32>
    %562 = arith.select %21, %523, %363 : vector<2x64xi1>, vector<2x64xf32>
    %563 = arith.select %21, %555, %331 : vector<2x64xi1>, vector<2x64xf32>
    %564 = tpu.concatenate %556, %557, %558, %559, %560, %561, %562, %563 in 0 : vector<2x64xf32>, vector<2x64xf32>, vector<2x64xf32>, vector<2x64xf32>, vector<2x64xf32>, vector<2x64xf32>, vector<2x64xf32>, vector<2x64xf32> -> vector<16x64xf32>
    %c0_86 = arith.constant 0 : index
    %c0_87 = arith.constant 0 : index
    %565 = vector.load %arg7[%c0_86, %c0_87] : memref<16x64xf32, #tpu.memory_space<vmem>>, vector<16x64xf32>
    tpu.vector_store %arg7[%c0_86, %c0_87], %564 {strides = array<i32>} : memref<16x64xf32, #tpu.memory_space<vmem>>, vector<16x64xf32>,
    return
  }
}

</mosaic_0001>

<bundles_post_ra>
// kernel: rnn_model_forward.1
= control target key start
LH: loop header
LB: loop body
LE: loop exit
PB: predicated region body
PF: predicated region fallthrough
CT: control target
= control target key end

     0   :  { %vm66_vm0 = vcmask 261120   ;;  %v2316_v26 = vmov 0.0   ;;  %v26_v28 = vlaneseq  ;;  %vm144_vm11 = vcmask 523264   ;;  %s3287_s1 = inlined_call_operand.vmem [shape: f32[32,256], index: 1, kind: input, shape index: {}]   ;;  %s3288_s2 = inlined_call_operand.vmem [shape: f32[64,256], index: 2, kind: input, shape index: {}]   ;;  %s3289_s0 = inlined_call_operand.vmem [shape: f32[16,32], index: 0, kind: input, shape index: {}]   ;;  %s3290_s3 = inlined_call_operand.vmem [shape: f32[1,256], index: 3, kind: input, shape index: {}]   ;;  %s3291_s4 = inlined_call_operand.vmem [shape: f32[64,256], index: 4, kind: input, shape index: {}]   ;;  %s3292_s5 = inlined_call_operand.vmem [shape: f32[64,256], index: 5, kind: input, shape index: {}]   ;;  %s3293_s6 = inlined_call_operand.vmem [shape: f32[1,256], index: 6, kind: input, shape index: {}]   ;;  %s3294_s7 = inlined_call_operand.vmem [shape: f32[16,64], index: 7, kind: output, shape index: {}]  }
   0x1   :  { %v64_v0 = vld [vmem:[%s3287_s1 + $0x30] sm:$0xff]  ;;  %v2369_v2 = vld [vmem:[%s3288_s2 + $0x78] sm:$0xff]  ;;  %v62_v3 = vld [vmem:[%s3287_s1 + $0x20] sm:$0xff] }
   0x2   :  { %v2364_v1 = vld [vmem:[%s3288_s2 + $0x70] sm:$0xff]  ;;  %85 = vmatpush.msra.mxu0 %v64_v0  ;;  %v2378_v4 = vld [vmem:[%s3288_s2 + $0x60] sm:$0xff]  ;;  %v2383_v5 = vld [vmem:[%s3288_s2 + $0x68] sm:$0xff]  ;;  %176 = vmatpush.msra.mxu3 %v2369_v2  ;;  %v2556_v29 = vand.u32 127, %v26_v28 }
   0x3   :  { %156 = vmatpush.msra.mxu2 %v2364_v1  ;;  %v65_v6 = vld [vmem:[%s3287_s1 + $0x38] sm:$0xff]  ;;  %v60_v7 = vld [vmem:[%s3287_s1 + $0x10] sm:$0xff]  ;;  %v63_v10 = vld [vmem:[%s3287_s1 + $0x28] sm:$0xff] }
   0x4   :  { %v2395_v8 = vld [vmem:[%s3288_s2 + $0x50] sm:$0xff]  ;;  %86 = vmatpush.msra.mxu0 %v62_v3  ;;  %v2401_v9 = vld [vmem:[%s3288_s2 + $0x58] sm:$0xff]  ;;  %177 = vmatpush.msra.mxu3 %v2383_v5  ;;  %v58_v11 = vld [vmem:[%s3287_s1] sm:$0xff]  ;;  %v33_v31 = vand.u32 63, %v2556_v29  ;;  %v28_v42 = vadd.s32 128, %v2556_v29 }
   0x5   :  { %157 = vmatpush.msra.mxu2 %v2378_v4  ;;  %108 = vmatpush.msra.mxu1 %v65_v6  ;;  %v2413_v12 = vld [vmem:[%s3288_s2 + $0x40] sm:$0xff]  ;;  %v2419_v13 = vld [vmem:[%s3288_s2 + $0x48] sm:$0xff]  ;;  %v61_v15 = vld [vmem:[%s3287_s1 + $0x18] sm:$0xff] }
   0x6   :  { %87 = vmatpush.msra.mxu0 %v60_v7  ;;  %v56_v14 = vld [vmem:[%s3289_s0] sm:$0xff]  ;;  %178 = vmatpush.msra.mxu3 %v2401_v9  ;;  %v2431_v16 = vld [vmem:[%s3288_s2 + $0x30] sm:$0xff]  ;;  %v2437_v17 = vld [vmem:[%s3288_s2 + $0x38] sm:$0xff]  ;;  %vm2565_vm1 = vcmp.lt.s32.totalorder %v33_v31, 32  ;;  %v40_v44 = vand.u32 63, %v28_v42 }
   0x7   :  { %158 = vmatpush.msra.mxu2 %v2395_v8  ;;  %109 = vmatpush.msra.mxu1 %v63_v10  ;;  %v59_v18 = vld [vmem:[%s3287_s1 + $0x8] sm:$0xff]  ;;  %v2447_v19 = vld [vmem:[%s3288_s2 + $0x20] sm:$0xff]  ;;  %v2459_v21 = vld [vmem:[%s3288_s2 + $0x10] sm:$0xff] }
   0x8   :  { %88 = vmatpush.msra.mxu0 %v58_v11  ;;  %179 = vmatpush.msra.mxu3 %v2419_v13  ;;  %v2453_v20 = vld [vmem:[%s3288_s2 + $0x28] sm:$0xff]  ;;  %v2466_v22 = vld [vmem:[%s3288_s2 + $0x18] sm:$0xff]  ;;  %v2473_v23 = vld [vmem:[%s3288_s2] sm:$0xff]  ;;  %vm2584_vm2 = vcmp.lt.s32.totalorder %v40_v44, 32 }
   0x9   :  { %159 = vmatpush.msra.mxu2 %v2413_v12  ;;  %2054 = vmatmul.msk.f32.vlgmr.msra.gmra.mxu0 %vm66_vm0, %v56_v14  ;;  %v2479_v24 = vld [vmem:[%s3288_s2 + $0x8] sm:$0xff]  ;;  %v135_v33 = vld [vmem:[%s3290_s3] sm:$0x3]  ;;  %s2317_s3 = smov 64  }
   0xa   :  { %110 = vmatpush.msra.mxu1 %v61_v15  ;;  %180 = vmatpush.msra.mxu3 %v2437_v17  ;;  %v57_v25 = vld [vmem:[%s3289_s0 + $0x8] sm:$0xff]  ;;  %v2569_v35 = vperm.slane %v135_v33, 0  ;;  %v2594_v52 = vperm.slane %v135_v33, 1 }
   0xb   :  { %160 = vmatpush.msra.mxu2 %v2431_v16  ;;  %264 = vmatpush.msrb.mxu0 %v2364_v1 }
   0xc   :  { %111 = vmatpush.msra.mxu1 %v59_v18  ;;  %181 = vmatpush.msra.mxu3 %v2453_v20 }
   0xd   :  { %161 = vmatpush.msra.mxu2 %v2447_v19  ;;  %2056 = vmatmul.msk.f32.vlgmr.msra.gmra.mxu1 %vm66_vm0, %v56_v14 }
   0xe   :  { %284 = vmatpush.msrb.mxu1 %v2369_v2  ;;  %182 = vmatpush.msra.mxu3 %v2466_v22 }
   0xf   :  { %162 = vmatpush.msra.mxu2 %v2459_v21  ;;  %265 = vmatpush.msrb.mxu0 %v2378_v4 }
  0x10   :  { %285 = vmatpush.msrb.mxu1 %v2383_v5  ;;  %183 = vmatpush.msra.mxu3 %v2479_v24 }
  0x11   :  { %163 = vmatpush.msra.mxu2 %v2473_v23  ;;  %2055 = vmatmul.msk.f32.gmra.mxu0 %vm66_vm0, %v57_v25 }
  0x12   :  { %164 = vmatmul.f32.vlgmr.msra.gmra.mxu2 %v2316_v26  ;;  %184 = vmatmul.f32.vlgmr.msra.gmra.mxu3 %v2316_v26 }
  0x13   :  { %266 = vmatpush.msrb.mxu0 %v2395_v8  ;;  %286 = vmatpush.msrb.mxu1 %v2401_v9 }
  0x14   :  { %371 = vmatpush.msrb.mxu2 %v2364_v1  ;;  %391 = vmatpush.msrb.mxu3 %v2369_v2 }
  0x15   :  { %2057 = vmatmul.msk.f32.gmra.mxu1 %vm66_vm0, %v57_v25  ;;  %267 = vmatpush.msrb.mxu0 %v2413_v12 }
  0x16   :  { %287 = vmatpush.msrb.mxu1 %v2419_v13  ;;  %372 = vmatpush.msrb.mxu2 %v2378_v4 }
  0x17   :  { %268 = vmatpush.msrb.mxu0 %v2431_v16  ;;  %392 = vmatpush.msrb.mxu3 %v2383_v5 }
  0x18   :  { %288 = vmatpush.msrb.mxu1 %v2437_v17  ;;  %373 = vmatpush.msrb.mxu2 %v2395_v8 }
  0x19   :  { %269 = vmatpush.msrb.mxu0 %v2447_v19  ;;  %393 = vmatpush.msrb.mxu3 %v2401_v9 }
  0x1a   :  { %289 = vmatpush.msrb.mxu1 %v2453_v20  ;;  %374 = vmatpush.msrb.mxu2 %v2413_v12 }
  0x1b   :  { %270 = vmatpush.msrb.mxu0 %v2459_v21  ;;  %394 = vmatpush.msrb.mxu3 %v2419_v13 }
  0x1c   :  { %290 = vmatpush.msrb.mxu1 %v2466_v22  ;;  %375 = vmatpush.msrb.mxu2 %v2431_v16 }
  0x1d   :  { %271 = vmatpush.msrb.mxu0 %v2473_v23  ;;  %395 = vmatpush.msrb.mxu3 %v2437_v17 }
  0x1e   :  { %291 = vmatpush.msrb.mxu1 %v2479_v24  ;;  %376 = vmatpush.msrb.mxu2 %v2447_v19 }
  0x1f   :  { %396 = vmatpush.msrb.mxu3 %v2453_v20  ;;  %478 = vmatpush.msra.mxu0 %v2364_v1 }
  0x20   :  { %377 = vmatpush.msrb.mxu2 %v2459_v21  ;;  %498 = vmatpush.msra.mxu1 %v2369_v2 }
  0x21   :  { %397 = vmatpush.msrb.mxu3 %v2466_v22  ;;  %479 = vmatpush.msra.mxu0 %v2378_v4 }
  0x22   :  { %378 = vmatpush.msrb.mxu2 %v2473_v23  ;;  %499 = vmatpush.msra.mxu1 %v2383_v5 }
  0x23   :  { %398 = vmatpush.msrb.mxu3 %v2479_v24  ;;  %480 = vmatpush.msra.mxu0 %v2395_v8 }
  0x24   :  { %500 = vmatpush.msra.mxu1 %v2401_v9  ;;  %593 = vmatpush.msra.mxu2 %v2364_v1 }
  0x25   :  { %481 = vmatpush.msra.mxu0 %v2413_v12  ;;  %613 = vmatpush.msra.mxu3 %v2369_v2 }
  0x26   :  { %501 = vmatpush.msra.mxu1 %v2419_v13  ;;  %594 = vmatpush.msra.mxu2 %v2378_v4 }
  0x27   :  { %482 = vmatpush.msra.mxu0 %v2431_v16  ;;  %614 = vmatpush.msra.mxu3 %v2383_v5 }
  0x28   :  { %502 = vmatpush.msra.mxu1 %v2437_v17  ;;  %595 = vmatpush.msra.mxu2 %v2395_v8 }
  0x29   :  { %483 = vmatpush.msra.mxu0 %v2447_v19  ;;  %615 = vmatpush.msra.mxu3 %v2401_v9 }
  0x2a   :  { %503 = vmatpush.msra.mxu1 %v2453_v20  ;;  %596 = vmatpush.msra.mxu2 %v2413_v12 }
  0x2b   :  { %484 = vmatpush.msra.mxu0 %v2459_v21  ;;  %616 = vmatpush.msra.mxu3 %v2419_v13 }
  0x2c   :  { %504 = vmatpush.msra.mxu1 %v2466_v22  ;;  %597 = vmatpush.msra.mxu2 %v2431_v16 }
  0x2d   :  { %485 = vmatpush.msra.mxu0 %v2473_v23  ;;  %617 = vmatpush.msra.mxu3 %v2437_v17 }
  0x2e   :  { %505 = vmatpush.msra.mxu1 %v2479_v24  ;;  %598 = vmatpush.msra.mxu2 %v2447_v19 }
  0x2f   :  { %618 = vmatpush.msra.mxu3 %v2453_v20 }
  0x30   :  { %599 = vmatpush.msra.mxu2 %v2459_v21 }
  0x31   :  { %619 = vmatpush.msra.mxu3 %v2466_v22 }
  0x32   :  { %600 = vmatpush.msra.mxu2 %v2473_v23 }
  0x33   :  { %620 = vmatpush.msra.mxu3 %v2479_v24 }
  0x86   :  { %v2554_v27 = vpop.f32.mrf.mxu0 }
  0x8a   :  { %v2571_v36 = vpop.f32.mrf.mxu1 }
  0x8e   :  { %v2558_v30 = vpop.f32.mrf.mxu0 }
  0x8f   :  { %v138_v32 = vrot.slane %v2558_v30, 6 }
  0x91   :  { %v2576_v37 = vsel %vm2565_vm1, %v2554_v27, %v138_v32 }
  0x92   :  { %v2581_v43 = vpop.f32.mrf.mxu1 }
  0x93   :  { %v139_v46 = vrot.slane %v2581_v43, 6 }
  0x95   :  { %v165_v38 = vpop.f32.mrf.mxu2  ;;  %v2591_v49 = vsel %vm2584_vm2, %v2571_v36, %v139_v46  ;;  %v185_v50 = vpop.f32.mrf.mxu3  ;;  %v245_v46 = vrot.slane %v2558_v30, 2 }
  0x96   :  { %v188_v39 = vadd.f32 %v165_v38, %v2576_v37  ;;  %v189_v51 = vadd.f32 %v185_v50, %v2591_v49 }
  0x98   :  { %v195_v40 = vadd.f32 %v2569_v35, %v188_v39  ;;  %v196_v55 = vadd.f32 %v2594_v52, %v189_v51  ;;  %v2628_v51 = vsel %vm2565_vm1, %v2554_v27, %v245_v46 }
  0x9a   :  { %v2058_v41 = vmul.f32 -1.442695, %v195_v40  ;;  %v2059_v6 = vmul.f32 -1.442695, %v196_v55 }
  0x9c   :  { %2124 = vpow2.f32 %v2058_v41 }
  0xa2   :  { %v2125_v45 = vpop.eup %2124 }
  0xa3   :  { %v200_v47 = vadd.f32 1.0, %v2125_v45 }
  0xa5   :  { %2126 = vrcp.f32 %v200_v47  ;;  %v212_v57 = vand.u32 2147483648, %v200_v47  ;;  %v210_v59 = vand.u32 2147483647, %v200_v47  ;;  %vm206_vm4 = vweird.f32 %v200_v47 }
  0xa6   :  { %2128 = vtanh.f32 %v196_v55 }
  0xa7   :  { %v213_v61 = vor.u32 1.1754944e-38, %v212_v57  ;;  %vm211_vm6 = vcmp.eq.f32.partialorder %v210_v59, 8.507059e+37  ;;  %2130 = vpow2.f32 %v2059_v6 }
  0xab   :  { %v2127_v53 = vpop.eup %2126 }
  0xac   :  { %v202_v54 = vmul.f32 %v2127_v53, %v200_v47  ;;  %vm207_vm3 = vweird.f32 %v2127_v53  ;;  %v2129_v63 = vpop.eup %2128 }
  0xad   :  { %vm208_vm5 = vmor %vm206_vm4, %vm207_vm3  ;;  %v2131_v7 = vpop.eup %2130 }
  0xae   :  { %v203_v56 = vsub.f32 1.0, %v202_v54  ;;  %v220_v10 = vadd.f32 1.0, %v2131_v7 }
  0xb0   :  { %v204_v58 = vmul.f32 %v2127_v53, %v203_v56  ;;  %2132 = vrcp.f32 %v220_v10  ;;  %v232_v32 = vand.u32 2147483648, %v220_v10  ;;  %vm226_vm7 = vweird.f32 %v220_v10 }
  0xb1   :  { %v230_v38 = vand.u32 2147483647, %v220_v10 }
  0xb2   :  { %v205_v60 = vadd.f32 %v2127_v53, %v204_v58  ;;  %v233_v39 = vor.u32 1.1754944e-38, %v232_v32  ;;  %v246_v58 = vrot.slane %v2581_v43, 2 }
  0xb3   :  { %vm231_vm10 = vcmp.eq.f32.partialorder %v230_v38, 8.507059e+37 }
  0xb4   :  { %v209_v62 = vsel %vm208_vm5, %v2127_v53, %v205_v60 }
  0xb5   :  { %v214_v0 = vsel %vm211_vm6, %v213_v61, %v209_v62  ;;  %v2636_v61 = vsel %vm2584_vm2, %v2571_v36, %v246_v58 }
  0xb6   :  { %v237_v3 = vmul.f32 %v2129_v63, %v214_v0  ;;  %v2133_v11 = vpop.eup %2132  ;;  %v236_v25 = vmul.f32 0.0, %v214_v0 }
  0xb7   :  { %v222_v14 = vmul.f32 %v2133_v11, %v220_v10  ;;  %vm227_vm8 = vweird.f32 %v2133_v11 }
  0xb8   :  { %239 = vrot.lane.b32.xlu0 %v237_v3, %s2317_s3  ;;  %vm228_vm9 = vmor %vm226_vm7, %vm227_vm8 }
  0xb9   :  { %v223_v15 = vsub.f32 1.0, %v222_v14 }
  0xbb   :  { %v224_v18 = vmul.f32 %v2133_v11, %v223_v15 }
  0xbd   :  { %v225_v33 = vadd.f32 %v2133_v11, %v224_v18 }
  0xbf   :  { %v229_v40 = vsel %vm228_vm9, %v2133_v11, %v225_v33 }
  0xc0   :  { %v234_v42 = vsel %vm231_vm10, %v233_v39, %v229_v40 }
 0x12a   :  { %v240_v28 = vpop.permute.xlu0 %239 }
 0x12b   :  { %v2598_v31 = vadd.f32 %v240_v28, %v236_v25 }
 0x12d   :  { %2134 = vtanh.f32 %v2598_v31  ;;  %v346_v18 = vrot.slane %v2598_v31, 6 }
 0x133   :  { %v2135_v41 = vpop.eup %2134 }
 0x134   :  { %v244_v44 = vmul.f32 %v2135_v41, %v234_v42 }
 0x136   :  { %252 = vrot.lane.b32.xlu0 %v244_v44, %s2317_s3 }
 0x1a8   :  { %v2602_v45 = vpop.permute.xlu0 %252 }
 0x1a9   :  { %2060 = vmatmul.msk.f32.vlgmr.msrb.gmra.mxu0 %vm144_vm11, %v2602_v45  ;;  %2061 = vmatmul.msk.f32.vlgmr.msrb.gmra.mxu1 %vm144_vm11, %v2602_v45 }
 0x1aa   :  { %699 = vmatpush.msrb.mxu0 %v2364_v1  ;;  %719 = vmatpush.msrb.mxu1 %v2369_v2 }
 0x1ac   :  { %700 = vmatpush.msrb.mxu0 %v2378_v4  ;;  %720 = vmatpush.msrb.mxu1 %v2383_v5 }
 0x1ae   :  { %701 = vmatpush.msrb.mxu0 %v2395_v8  ;;  %721 = vmatpush.msrb.mxu1 %v2401_v9 }
 0x1b0   :  { %702 = vmatpush.msrb.mxu0 %v2413_v12  ;;  %722 = vmatpush.msrb.mxu1 %v2419_v13 }
 0x1b2   :  { %703 = vmatpush.msrb.mxu0 %v2431_v16  ;;  %723 = vmatpush.msrb.mxu1 %v2437_v17 }
 0x1b4   :  { %704 = vmatpush.msrb.mxu0 %v2447_v19  ;;  %724 = vmatpush.msrb.mxu1 %v2453_v20 }
 0x1b6   :  { %705 = vmatpush.msrb.mxu0 %v2459_v21  ;;  %725 = vmatpush.msrb.mxu1 %v2466_v22 }
 0x1b8   :  { %706 = vmatpush.msrb.mxu0 %v2473_v23  ;;  %726 = vmatpush.msrb.mxu1 %v2479_v24 }
 0x226   :  { %v273_v47 = vpop.f32.mrf.mxu0  ;;  %v293_v56 = vpop.f32.mrf.mxu1 }
 0x227   :  { %v298_v50 = vrot.slane %v273_v47, 6  ;;  %v299_v60 = vrot.slane %v293_v56, 6 }
 0x229   :  { %v302_v53 = vadd.f32 %v298_v50, %v2628_v51  ;;  %v303_v62 = vadd.f32 %v299_v60, %v2636_v61 }
 0x22b   :  { %v304_v54 = vadd.f32 %v302_v53, %v2569_v35  ;;  %v305_v0 = vadd.f32 %v303_v62, %v2594_v52 }
 0x22d   :  { %v2062_v55 = vmul.f32 -1.442695, %v304_v54  ;;  %v2063_v39 = vmul.f32 -1.442695, %v305_v0 }
 0x22f   :  { %2136 = vpow2.f32 %v2062_v55 }
 0x235   :  { %v2137_v57 = vpop.eup %2136 }
 0x236   :  { %v309_v59 = vadd.f32 1.0, %v2137_v57 }
 0x238   :  { %2138 = vrcp.f32 %v309_v59  ;;  %v321_v7 = vand.u32 2147483648, %v309_v59  ;;  %v319_v11 = vand.u32 2147483647, %v309_v59  ;;  %vm315_vm13 = vweird.f32 %v309_v59 }
 0x239   :  { %2140 = vtanh.f32 %v305_v0 }
 0x23a   :  { %v322_v15 = vor.u32 1.1754944e-38, %v321_v7  ;;  %vm320_vm15 = vcmp.eq.f32.partialorder %v319_v11, 8.507059e+37  ;;  %2142 = vpow2.f32 %v2063_v39 }
 0x23e   :  { %v2139_v63 = vpop.eup %2138 }
 0x23f   :  { %v311_v3 = vmul.f32 %v2139_v63, %v309_v59  ;;  %vm316_vm12 = vweird.f32 %v2139_v63  ;;  %v2141_v28 = vpop.eup %2140 }
 0x240   :  { %vm317_vm14 = vmor %vm315_vm13, %vm316_vm12  ;;  %v2143_v40 = vpop.eup %2142 }
 0x241   :  { %v312_v6 = vsub.f32 1.0, %v311_v3  ;;  %v329_v41 = vadd.f32 1.0, %v2143_v40 }
 0x243   :  { %v313_v10 = vmul.f32 %v2139_v63, %v312_v6  ;;  %2144 = vrcp.f32 %v329_v41  ;;  %v341_v54 = vand.u32 2147483648, %v329_v41  ;;  %vm335_vm3 = vweird.f32 %v329_v41 }
 0x244   :  { %v339_v55 = vand.u32 2147483647, %v329_v41 }
 0x245   :  { %v314_v14 = vadd.f32 %v2139_v63, %v313_v10  ;;  %v342_v57 = vor.u32 1.1754944e-38, %v341_v54 }
 0x246   :  { %vm340_vm5 = vcmp.eq.f32.partialorder %v339_v55, 8.507059e+37 }
 0x247   :  { %v318_v25 = vsel %vm317_vm14, %v2139_v63, %v314_v14 }
 0x248   :  { %v323_v32 = vsel %vm320_vm15, %v322_v15, %v318_v25 }
 0x249   :  { %v349_v33 = vmul.f32 %v2141_v28, %v323_v32  ;;  %v348_v38 = vmul.f32 %v346_v18, %v323_v32  ;;  %v2145_v42 = vpop.eup %2144 }
 0x24a   :  { %v331_v44 = vmul.f32 %v2145_v42, %v329_v41  ;;  %vm336_vm0 = vweird.f32 %v2145_v42 }
 0x24b   :  { %351 = vrot.lane.b32.xlu1 %v349_v33, %s2317_s3  ;;  %vm337_vm4 = vmor %vm335_vm3, %vm336_vm0 }
 0x24c   :  { %v332_v46 = vsub.f32 1.0, %v331_v44 }
 0x24e   :  { %v333_v47 = vmul.f32 %v2145_v42, %v332_v46 }
 0x250   :  { %v334_v31 = vadd.f32 %v2145_v42, %v333_v47 }
 0x252   :  { %v338_v56 = vsel %vm337_vm4, %v2145_v42, %v334_v31 }
 0x253   :  { %v343_v59 = vsel %vm340_vm5, %v342_v57, %v338_v56 }
 0x2bd   :  { %v352_v50 = vpop.permute.xlu1 %351 }
 0x2be   :  { %v2642_v53 = vadd.f32 %v352_v50, %v348_v38 }
 0x2c0   :  { %2146 = vtanh.f32 %v2642_v53  ;;  %v453_v44 = vrot.slane %v2642_v53, 6 }
 0x2c6   :  { %v2147_v58 = vpop.eup %2146 }
 0x2c7   :  { %v356_v60 = vmul.f32 %v2147_v58, %v343_v59 }
 0x2c9   :  { %v358_v62 = vrot.slane %v356_v60, 2 }
 0x2cb   :  { %359 = vrot.lane.b32.xlu1 %v358_v62, %s2317_s3 }
 0x33d   :  { %v2646_v63 = vpop.permute.xlu1 %359 }
 0x33e   :  { %2064 = vmatmul.msk.f32.vlgmr.msrb.gmra.mxu2 %vm144_vm11, %v2646_v63  ;;  %2065 = vmatmul.msk.f32.vlgmr.msrb.gmra.mxu3 %vm144_vm11, %v2646_v63 }
 0x33f   :  { %806 = vmatpush.msrb.mxu2 %v2364_v1  ;;  %826 = vmatpush.msrb.mxu3 %v2369_v2 }
 0x341   :  { %807 = vmatpush.msrb.mxu2 %v2378_v4  ;;  %827 = vmatpush.msrb.mxu3 %v2383_v5 }
 0x343   :  { %808 = vmatpush.msrb.mxu2 %v2395_v8  ;;  %828 = vmatpush.msrb.mxu3 %v2401_v9 }
 0x345   :  { %809 = vmatpush.msrb.mxu2 %v2413_v12  ;;  %829 = vmatpush.msrb.mxu3 %v2419_v13 }
 0x347   :  { %810 = vmatpush.msrb.mxu2 %v2431_v16  ;;  %830 = vmatpush.msrb.mxu3 %v2437_v17 }
 0x349   :  { %811 = vmatpush.msrb.mxu2 %v2447_v19  ;;  %831 = vmatpush.msrb.mxu3 %v2453_v20 }
 0x34b   :  { %812 = vmatpush.msrb.mxu2 %v2459_v21  ;;  %832 = vmatpush.msrb.mxu3 %v2466_v22 }
 0x34d   :  { %813 = vmatpush.msrb.mxu2 %v2473_v23  ;;  %833 = vmatpush.msrb.mxu3 %v2479_v24 }
 0x3c1   :  { %v380_v0 = vpop.f32.mrf.mxu2  ;;  %v400_v11 = vpop.f32.mrf.mxu3 }
 0x3c2   :  { %v405_v3 = vrot.slane %v380_v0, 4  ;;  %v406_v18 = vrot.slane %v400_v11, 4 }
 0x3c4   :  { %v409_v6 = vadd.f32 %v405_v3, %v2576_v37  ;;  %v410_v25 = vadd.f32 %v406_v18, %v2591_v49 }
 0x3c6   :  { %v411_v7 = vadd.f32 %v409_v6, %v2569_v35  ;;  %v412_v32 = vadd.f32 %v410_v25, %v2594_v52 }
 0x3c8   :  { %v2066_v10 = vmul.f32 -1.442695, %v411_v7  ;;  %v2067_v54 = vmul.f32 -1.442695, %v412_v32 }
 0x3ca   :  { %2148 = vpow2.f32 %v2066_v10 }
 0x3d0   :  { %v2149_v14 = vpop.eup %2148 }
 0x3d1   :  { %v416_v15 = vadd.f32 1.0, %v2149_v14 }
 0x3d3   :  { %2150 = vrcp.f32 %v416_v15  ;;  %v428_v39 = vand.u32 2147483648, %v416_v15  ;;  %v426_v37 = vand.u32 2147483647, %v416_v15  ;;  %vm422_vm7 = vweird.f32 %v416_v15 }
 0x3d4   :  { %2152 = vtanh.f32 %v412_v32 }
 0x3d5   :  { %v429_v42 = vor.u32 1.1754944e-38, %v428_v39  ;;  %vm427_vm9 = vcmp.eq.f32.partialorder %v426_v37, 8.507059e+37  ;;  %2154 = vpow2.f32 %v2067_v54 }
 0x3d9   :  { %v2151_v28 = vpop.eup %2150 }
 0x3da   :  { %v418_v33 = vmul.f32 %v2151_v28, %v416_v15  ;;  %vm423_vm6 = vweird.f32 %v2151_v28  ;;  %v2153_v47 = vpop.eup %2152 }
 0x3db   :  { %vm424_vm8 = vmor %vm422_vm7, %vm423_vm6  ;;  %v2155_v55 = vpop.eup %2154 }
 0x3dc   :  { %v419_v38 = vsub.f32 1.0, %v418_v33  ;;  %v436_v56 = vadd.f32 1.0, %v2155_v55 }
 0x3de   :  { %v420_v40 = vmul.f32 %v2151_v28, %v419_v38  ;;  %2156 = vrcp.f32 %v436_v56  ;;  %v448_v3 = vand.u32 2147483648, %v436_v56  ;;  %vm442_vm12 = vweird.f32 %v436_v56 }
 0x3df   :  { %v446_v6 = vand.u32 2147483647, %v436_v56 }
 0x3e0   :  { %v421_v41 = vadd.f32 %v2151_v28, %v420_v40  ;;  %v449_v10 = vor.u32 1.1754944e-38, %v448_v3 }
 0x3e1   :  { %vm447_vm14 = vcmp.eq.f32.partialorder %v446_v6, 8.507059e+37  ;;  %v573_v6 = vrot.slane %v2554_v27, 6 }
 0x3e2   :  { %v425_v46 = vsel %vm424_vm8, %v2151_v28, %v421_v41 }
 0x3e3   :  { %v430_v49 = vsel %vm427_vm9, %v429_v42, %v425_v46 }
 0x3e4   :  { %v456_v50 = vmul.f32 %v2153_v47, %v430_v49  ;;  %v455_v31 = vmul.f32 %v453_v44, %v430_v49  ;;  %v2157_v57 = vpop.eup %2156 }
 0x3e5   :  { %v438_v58 = vmul.f32 %v2157_v57, %v436_v56  ;;  %vm443_vm10 = vweird.f32 %v2157_v57 }
 0x3e6   :  { %458 = vrot.lane.b32.xlu2 %v456_v50, %s2317_s3  ;;  %vm444_vm13 = vmor %vm442_vm12, %vm443_vm10 }
 0x3e7   :  { %v439_v59 = vsub.f32 1.0, %v438_v58 }
 0x3e9   :  { %v440_v60 = vmul.f32 %v2157_v57, %v439_v59 }
 0x3eb   :  { %v441_v53 = vadd.f32 %v2157_v57, %v440_v60 }
 0x3ed   :  { %v445_v7 = vsel %vm444_vm13, %v2157_v57, %v441_v53 }
 0x3ee   :  { %v450_v14 = vsel %vm447_vm14, %v449_v10, %v445_v7  ;;  %v2717_v7 = vsel %vm2565_vm1, %v2558_v30, %v573_v6 }
 0x440   :  { %v459_v62 = vpop.permute.xlu2 %458 }
 0x441   :  { %v2674_v0 = vadd.f32 %v459_v62, %v455_v31 }
 0x443   :  { %2158 = vtanh.f32 %v2674_v0  ;;  %v560_v33 = vrot.slane %v2674_v0, 6 }
 0x449   :  { %v2159_v11 = vpop.eup %2158 }
 0x44a   :  { %v463_v15 = vmul.f32 %v2159_v11, %v450_v14 }
 0x44c   :  { %v465_v18 = vrot.slane %v463_v15, 4 }
 0x44e   :  { %466 = vrot.lane.b32.xlu2 %v465_v18, %s2317_s3 }
 0x4a8   :  { %v2678_v25 = vpop.permute.xlu2 %466 }
 0x4a9   :  { %2068 = vmatmul.msk.f32.vlgmr.msra.gmra.mxu0 %vm144_vm11, %v2678_v25  ;;  %2069 = vmatmul.msk.f32.vlgmr.msra.gmra.mxu1 %vm144_vm11, %v2678_v25 }
 0x4aa   :  { %913 = vmatpush.msra.mxu0 %v2364_v1  ;;  %933 = vmatpush.msra.mxu1 %v2369_v2 }
 0x4ac   :  { %914 = vmatpush.msra.mxu0 %v2378_v4  ;;  %934 = vmatpush.msra.mxu1 %v2383_v5 }
 0x4ae   :  { %915 = vmatpush.msra.mxu0 %v2395_v8  ;;  %935 = vmatpush.msra.mxu1 %v2401_v9 }
 0x4b0   :  { %916 = vmatpush.msra.mxu0 %v2413_v12  ;;  %936 = vmatpush.msra.mxu1 %v2419_v13 }
 0x4b2   :  { %917 = vmatpush.msra.mxu0 %v2431_v16  ;;  %937 = vmatpush.msra.mxu1 %v2437_v17 }
 0x4b4   :  { %918 = vmatpush.msra.mxu0 %v2447_v19  ;;  %938 = vmatpush.msra.mxu1 %v2453_v20 }
 0x4b6   :  { %919 = vmatpush.msra.mxu0 %v2459_v21  ;;  %939 = vmatpush.msra.mxu1 %v2466_v22 }
 0x4b8   :  { %920 = vmatpush.msra.mxu0 %v2473_v23  ;;  %940 = vmatpush.msra.mxu1 %v2479_v24 }
 0x526   :  { %v487_v1 = vpop.f32.mrf.mxu0  ;;  %v507_v9 = vpop.f32.mrf.mxu1 }
 0x527   :  { %v512_v2 = vrot.slane %v487_v1, 2  ;;  %v513_v16 = vrot.slane %v507_v9, 2  ;;  %v574_v1 = vrot.slane %v2571_v36, 6 }
 0x529   :  { %v516_v4 = vadd.f32 %v512_v2, %v2628_v51  ;;  %v517_v17 = vadd.f32 %v513_v16, %v2636_v61 }
 0x52b   :  { %v518_v5 = vadd.f32 %v516_v4, %v2569_v35  ;;  %v519_v20 = vadd.f32 %v517_v17, %v2594_v52 }
 0x52d   :  { %v2070_v8 = vmul.f32 -1.442695, %v518_v5  ;;  %v2071_v41 = vmul.f32 -1.442695, %v519_v20  ;;  %v2725_v5 = vsel %vm2584_vm2, %v2581_v43, %v574_v1 }
 0x52f   :  { %2160 = vpow2.f32 %v2070_v8 }
 0x535   :  { %v2161_v12 = vpop.eup %2160 }
 0x536   :  { %v523_v13 = vadd.f32 1.0, %v2161_v12 }
 0x538   :  { %2162 = vrcp.f32 %v523_v13  ;;  %v535_v23 = vand.u32 2147483648, %v523_v13  ;;  %v533_v51 = vand.u32 2147483647, %v523_v13  ;;  %vm529_vm0 = vweird.f32 %v523_v13 }
 0x539   :  { %2164 = vtanh.f32 %v519_v20 }
 0x53a   :  { %v536_v32 = vor.u32 1.1754944e-38, %v535_v23  ;;  %vm534_vm4 = vcmp.eq.f32.partialorder %v533_v51, 8.507059e+37  ;;  %2166 = vpow2.f32 %v2071_v41 }
 0x53e   :  { %v2163_v19 = vpop.eup %2162 }
 0x53f   :  { %v525_v21 = vmul.f32 %v2163_v19, %v523_v13  ;;  %vm530_vm15 = vweird.f32 %v2163_v19  ;;  %v2165_v39 = vpop.eup %2164 }
 0x540   :  { %vm531_vm3 = vmor %vm529_vm0, %vm530_vm15  ;;  %v2167_v42 = vpop.eup %2166 }
 0x541   :  { %v526_v22 = vsub.f32 1.0, %v525_v21  ;;  %v543_v44 = vadd.f32 1.0, %v2167_v42 }
 0x543   :  { %v527_v24 = vmul.f32 %v2163_v19, %v526_v22  ;;  %2168 = vrcp.f32 %v543_v44  ;;  %v555_v56 = vand.u32 2147483648, %v543_v44  ;;  %vm549_vm6 = vweird.f32 %v543_v44 }
 0x544   :  { %v553_v57 = vand.u32 2147483647, %v543_v44 }
 0x545   :  { %v528_v28 = vadd.f32 %v2163_v19, %v527_v24  ;;  %v556_v59 = vor.u32 1.1754944e-38, %v555_v56 }
 0x546   :  { %vm554_vm8 = vcmp.eq.f32.partialorder %v553_v57, 8.507059e+37 }
 0x547   :  { %v532_v38 = vsel %vm531_vm3, %v2163_v19, %v528_v28 }
 0x548   :  { %v537_v61 = vsel %vm534_vm4, %v536_v32, %v532_v38 }
 0x549   :  { %v563_v40 = vmul.f32 %v2165_v39, %v537_v61  ;;  %v562_v37 = vmul.f32 %v560_v33, %v537_v61  ;;  %v2169_v46 = vpop.eup %2168 }
 0x54a   :  { %v545_v47 = vmul.f32 %v2169_v46, %v543_v44  ;;  %vm550_vm5 = vweird.f32 %v2169_v46 }
 0x54b   :  { %565 = vrot.lane.b32.xlu0 %v563_v40, %s2317_s3  ;;  %vm551_vm7 = vmor %vm549_vm6, %vm550_vm5 }
 0x54c   :  { %v546_v49 = vsub.f32 1.0, %v545_v47 }
 0x54e   :  { %v547_v50 = vmul.f32 %v2169_v46, %v546_v49 }
 0x550   :  { %v548_v55 = vadd.f32 %v2169_v46, %v547_v50 }
 0x552   :  { %v552_v58 = vsel %vm551_vm7, %v2169_v46, %v548_v55 }
 0x553   :  { %v557_v62 = vsel %vm554_vm8, %v556_v59, %v552_v58  ;;  %v680_v59 = vrot.slane %v2554_v27, 2 }
 0x5bd   :  { %v566_v31 = vpop.permute.xlu0 %565 }
 0x5be   :  { %v568_v54 = vadd.f32 %v566_v31, %v562_v37 }
 0x5c0   :  { %2170 = vtanh.f32 %v568_v54  ;;  %v669_v23 = vrot.slane %v568_v54, 6 }
 0x5c6   :  { %v2171_v60 = vpop.eup %2170 }
 0x5c7   :  { %v570_v0 = vmul.f32 %v2171_v60, %v557_v62 }
 0x5c9   :  { %v580_v53 = vrot.slane %v570_v0, 6  ;;  %v2741_v0 = vsel %vm2565_vm1, %v2558_v30, %v680_v59 }
 0x5cb   :  { %581 = vrot.lane.b32.xlu1 %v580_v53, %s2317_s3 }
 0x63d   :  { %v2707_v3 = vpop.permute.xlu1 %581 }
 0x63e   :  { %2072 = vmatmul.msk.f32.vlgmr.msra.gmra.mxu2 %vm144_vm11, %v2707_v3  ;;  %2073 = vmatmul.msk.f32.vlgmr.msra.gmra.mxu3 %vm144_vm11, %v2707_v3 }
 0x6c1   :  { %v602_v10 = vpop.f32.mrf.mxu2  ;;  %v622_v4 = vpop.f32.mrf.mxu3 }
 0x6c2   :  { %v625_v11 = vadd.f32 %v602_v10, %v2717_v7  ;;  %v626_v8 = vadd.f32 %v622_v4, %v2725_v5 }
 0x6c4   :  { %v627_v14 = vadd.f32 %v625_v11, %v2569_v35  ;;  %v628_v12 = vadd.f32 %v626_v8, %v2594_v52 }
 0x6c6   :  { %v2074_v15 = vmul.f32 -1.442695, %v627_v14  ;;  %v2075_v38 = vmul.f32 -1.442695, %v628_v12 }
 0x6c8   :  { %2172 = vpow2.f32 %v2074_v15  ;;  %v681_v15 = vrot.slane %v2571_v36, 2 }
 0x6ca   :  { %v2749_v27 = vsel %vm2584_vm2, %v2581_v43, %v681_v15 }
 0x6ce   :  { %v2173_v18 = vpop.eup %2172 }
 0x6cf   :  { %v632_v2 = vadd.f32 1.0, %v2173_v18 }
 0x6d1   :  { %2174 = vrcp.f32 %v632_v2  ;;  %v644_v17 = vand.u32 2147483648, %v632_v2  ;;  %v642_v20 = vand.u32 2147483647, %v632_v2  ;;  %vm638_vm10 = vweird.f32 %v632_v2 }
 0x6d2   :  { %2176 = vtanh.f32 %v628_v12 }
 0x6d3   :  { %v645_v22 = vor.u32 1.1754944e-38, %v644_v17  ;;  %vm643_vm13 = vcmp.eq.f32.partialorder %v642_v20, 8.507059e+37  ;;  %2178 = vpow2.f32 %v2075_v38 }
 0x6d7   :  { %v2175_v9 = vpop.eup %2174 }
 0x6d8   :  { %v634_v13 = vmul.f32 %v2175_v9, %v632_v2  ;;  %vm639_vm9 = vweird.f32 %v2175_v9  ;;  %v2177_v51 = vpop.eup %2176 }
 0x6d9   :  { %vm640_vm12 = vmor %vm638_vm10, %vm639_vm9  ;;  %v2179_v39 = vpop.eup %2178 }
 0x6da   :  { %v635_v16 = vsub.f32 1.0, %v634_v13  ;;  %v652_v61 = vadd.f32 1.0, %v2179_v39 }
 0x6dc   :  { %v636_v19 = vmul.f32 %v2175_v9, %v635_v16  ;;  %2180 = vrcp.f32 %v652_v61  ;;  %v664_v49 = vand.u32 2147483648, %v652_v61  ;;  %vm658_vm15 = vweird.f32 %v652_v61 }
 0x6dd   :  { %v662_v50 = vand.u32 2147483647, %v652_v61 }
 0x6de   :  { %v637_v21 = vadd.f32 %v2175_v9, %v636_v19  ;;  %v665_v54 = vor.u32 1.1754944e-38, %v664_v49 }
 0x6df   :  { %vm663_vm3 = vcmp.eq.f32.partialorder %v662_v50, 8.507059e+37 }
 0x6e0   :  { %v641_v24 = vsel %vm640_vm12, %v2175_v9, %v637_v21 }
 0x6e1   :  { %v646_v28 = vsel %vm643_vm13, %v645_v22, %v641_v24 }
 0x6e2   :  { %v672_v32 = vmul.f32 %v2177_v51, %v646_v28  ;;  %v671_v33 = vmul.f32 %v669_v23, %v646_v28  ;;  %v2181_v40 = vpop.eup %2180 }
 0x6e3   :  { %v654_v37 = vmul.f32 %v2181_v40, %v652_v61  ;;  %vm659_vm14 = vweird.f32 %v2181_v40 }
 0x6e4   :  { %674 = vrot.lane.b32.xlu2 %v672_v32, %s2317_s3  ;;  %vm660_vm0 = vmor %vm658_vm15, %vm659_vm14 }
 0x6e5   :  { %v655_v41 = vsub.f32 1.0, %v654_v37 }
 0x6e7   :  { %v656_v42 = vmul.f32 %v2181_v40, %v655_v41 }
 0x6e9   :  { %v657_v47 = vadd.f32 %v2181_v40, %v656_v42 }
 0x6eb   :  { %v661_v31 = vsel %vm660_vm0, %v2181_v40, %v657_v47 }
 0x6ec   :  { %v666_v56 = vsel %vm663_vm3, %v665_v54, %v661_v31 }
 0x73e   :  { %v675_v44 = vpop.permute.xlu2 %674 }
 0x73f   :  { %v677_v46 = vadd.f32 %v675_v44, %v671_v33 }
 0x741   :  { %2182 = vtanh.f32 %v677_v46  ;;  %v781_v19 = vrot.slane %v677_v46, 6 }
 0x747   :  { %v2183_v55 = vpop.eup %2182 }
 0x748   :  { %v679_v57 = vmul.f32 %v2183_v55, %v666_v56 }
 0x74a   :  { %687 = vrot.lane.b32.xlu0 %v679_v57, %s2317_s3 }
 0x7bc   :  { %v2731_v58 = vpop.permute.xlu0 %687 }
 0x7bd   :  { %2076 = vmatmul.msk.f32.vlgmr.msrb.gmra.mxu0 %vm144_vm11, %v2731_v58  ;;  %2077 = vmatmul.msk.f32.vlgmr.msrb.gmra.mxu1 %vm144_vm11, %v2731_v58 }
 0x83a   :  { %v708_v60 = vpop.f32.mrf.mxu0  ;;  %v728_v11 = vpop.f32.mrf.mxu1 }
 0x83b   :  { %v733_v62 = vrot.slane %v708_v60, 6  ;;  %v734_v1 = vrot.slane %v728_v11, 6 }
 0x83d   :  { %v737_v53 = vadd.f32 %v733_v62, %v2741_v0  ;;  %v738_v30 = vadd.f32 %v734_v1, %v2749_v27 }
 0x83f   :  { %v739_v6 = vadd.f32 %v737_v53, %v2569_v35  ;;  %v740_v4 = vadd.f32 %v738_v30, %v2594_v52 }
 0x841   :  { %v2078_v10 = vmul.f32 -1.442695, %v739_v6  ;;  %v2079_v24 = vmul.f32 -1.442695, %v740_v4 }
 0x843   :  { %2184 = vpow2.f32 %v2078_v10 }
 0x849   :  { %v2185_v14 = vpop.eup %2184 }
 0x84a   :  { %v744_v18 = vadd.f32 1.0, %v2185_v14 }
 0x84c   :  { %2186 = vrcp.f32 %v744_v18  ;;  %v756_v12 = vand.u32 2147483648, %v744_v18  ;;  %v754_v36 = vand.u32 2147483647, %v744_v18  ;;  %vm750_vm5 = vweird.f32 %v744_v18 }
 0x84d   :  { %2188 = vtanh.f32 %v740_v4 }
 0x84e   :  { %v757_v17 = vor.u32 1.1754944e-38, %v756_v12  ;;  %vm755_vm7 = vcmp.eq.f32.partialorder %v754_v36, 8.507059e+37  ;;  %2190 = vpow2.f32 %v2079_v24 }
 0x852   :  { %v2187_v2 = vpop.eup %2186 }
 0x853   :  { %v746_v8 = vmul.f32 %v2187_v2, %v744_v18  ;;  %vm751_vm4 = vweird.f32 %v2187_v2  ;;  %v2189_v43 = vpop.eup %2188 }
 0x854   :  { %vm752_vm6 = vmor %vm750_vm5, %vm751_vm4  ;;  %v2191_v51 = vpop.eup %2190 }
 0x855   :  { %v747_v9 = vsub.f32 1.0, %v746_v8  ;;  %v764_v28 = vadd.f32 1.0, %v2191_v51 }
 0x857   :  { %v748_v13 = vmul.f32 %v2187_v2, %v747_v9  ;;  %2192 = vrcp.f32 %v764_v28  ;;  %v776_v41 = vand.u32 2147483648, %v764_v28  ;;  %vm770_vm9 = vweird.f32 %v764_v28 }
 0x858   :  { %v774_v42 = vand.u32 2147483647, %v764_v28 }
 0x859   :  { %v749_v16 = vadd.f32 %v2187_v2, %v748_v13  ;;  %v777_v46 = vor.u32 1.1754944e-38, %v776_v41 }
 0x85a   :  { %vm775_vm12 = vcmp.eq.f32.partialorder %v774_v42, 8.507059e+37 }
 0x85b   :  { %v753_v20 = vsel %vm752_vm6, %v2187_v2, %v749_v16 }
 0x85c   :  { %v758_v21 = vsel %vm755_vm7, %v757_v17, %v753_v20 }
 0x85d   :  { %v784_v22 = vmul.f32 %v2189_v43, %v758_v21  ;;  %v783_v23 = vmul.f32 %v781_v19, %v758_v21  ;;  %v2193_v32 = vpop.eup %2192 }
 0x85e   :  { %v766_v33 = vmul.f32 %v2193_v32, %v764_v28  ;;  %vm771_vm8 = vweird.f32 %v2193_v32 }
 0x85f   :  { %786 = vrot.lane.b32.xlu1 %v784_v22, %s2317_s3  ;;  %vm772_vm10 = vmor %vm770_vm9, %vm771_vm8 }
 0x860   :  { %v767_v38 = vsub.f32 1.0, %v766_v33 }
 0x862   :  { %v768_v39 = vmul.f32 %v2193_v32, %v767_v38 }
 0x864   :  { %v769_v37 = vadd.f32 %v2193_v32, %v768_v39 }
 0x866   :  { %v773_v44 = vsel %vm772_vm10, %v2193_v32, %v769_v37 }
 0x867   :  { %v778_v49 = vsel %vm775_vm12, %v777_v46, %v773_v44 }
 0x8d1   :  { %v787_v61 = vpop.permute.xlu1 %786 }
 0x8d2   :  { %v789_v40 = vadd.f32 %v787_v61, %v783_v23 }
 0x8d4   :  { %2194 = vtanh.f32 %v789_v40  ;;  %v888_v9 = vrot.slane %v789_v40, 6 }
 0x8da   :  { %v2195_v47 = vpop.eup %2194 }
 0x8db   :  { %v791_v50 = vmul.f32 %v2195_v47, %v778_v49 }
 0x8dd   :  { %v793_v31 = vrot.slane %v791_v50, 2 }
 0x8df   :  { %794 = vrot.lane.b32.xlu2 %v793_v31, %s2317_s3 }
 0x939   :  { %v2755_v54 = vpop.permute.xlu2 %794 }
 0x93a   :  { %2080 = vmatmul.msk.f32.vlgmr.msrb.gmra.mxu2 %vm144_vm11, %v2755_v54  ;;  %2081 = vmatmul.msk.f32.vlgmr.msrb.gmra.mxu3 %vm144_vm11, %v2755_v54 }
 0x9bd   :  { %v815_v55 = vpop.f32.mrf.mxu2  ;;  %v835_v62 = vpop.f32.mrf.mxu3 }
 0x9be   :  { %v840_v56 = vrot.slane %v815_v55, 4  ;;  %v841_v10 = vrot.slane %v835_v62, 4 }
 0x9c0   :  { %v844_v57 = vadd.f32 %v840_v56, %v2717_v7  ;;  %v845_v11 = vadd.f32 %v841_v10, %v2725_v5 }
 0x9c2   :  { %v846_v59 = vadd.f32 %v844_v57, %v2569_v35  ;;  %v847_v15 = vadd.f32 %v845_v11, %v2594_v52 }
 0x9c4   :  { %v2082_v60 = vmul.f32 -1.442695, %v846_v59  ;;  %v2083_v17 = vmul.f32 -1.442695, %v847_v15 }
 0x9c6   :  { %2196 = vpow2.f32 %v2082_v60 }
 0x9cc   :  { %v2197_v53 = vpop.eup %2196 }
 0x9cd   :  { %v851_v6 = vadd.f32 1.0, %v2197_v53 }
 0x9cf   :  { %2198 = vrcp.f32 %v851_v6  ;;  %v863_v30 = vand.u32 2147483648, %v851_v6  ;;  %v861_v7 = vand.u32 2147483647, %v851_v6  ;;  %vm857_vm14 = vweird.f32 %v851_v6 }
 0x9d0   :  { %2200 = vtanh.f32 %v847_v15 }
 0x9d1   :  { %v864_v8 = vor.u32 1.1754944e-38, %v863_v30  ;;  %vm862_vm0 = vcmp.eq.f32.partialorder %v861_v7, 8.507059e+37  ;;  %2202 = vpow2.f32 %v2083_v17  ;;  %v1062_v17 = vld [vmem:[%s3291_s4 + $0x48] sm:$0xff] }
 0x9d5   :  { %v2199_v14 = vpop.eup %2198 }
 0x9d6   :  { %v853_v18 = vmul.f32 %v2199_v14, %v851_v6  ;;  %vm858_vm13 = vweird.f32 %v2199_v14  ;;  %v2201_v13 = vpop.eup %2200 }
 0x9d7   :  { %vm859_vm15 = vmor %vm857_vm14, %vm858_vm13  ;;  %v2203_v19 = vpop.eup %2202 }
 0x9d8   :  { %v854_v1 = vsub.f32 1.0, %v853_v18  ;;  %v871_v20 = vadd.f32 1.0, %v2203_v19 }
 0x9da   :  { %v855_v2 = vmul.f32 %v2199_v14, %v854_v1  ;;  %2204 = vrcp.f32 %v871_v20  ;;  %v883_v32 = vand.u32 2147483648, %v871_v20  ;;  %vm877_vm4 = vweird.f32 %v871_v20 }
 0x9db   :  { %v881_v33 = vand.u32 2147483647, %v871_v20 }
 0x9dc   :  { %v856_v4 = vadd.f32 %v2199_v14, %v855_v2  ;;  %v884_v39 = vor.u32 1.1754944e-38, %v883_v32 }
 0x9dd   :  { %vm882_vm6 = vcmp.eq.f32.partialorder %v881_v33, 8.507059e+37 }
 0x9de   :  { %v860_v12 = vsel %vm859_vm15, %v2199_v14, %v856_v4 }
 0x9df   :  { %v865_v36 = vsel %vm862_vm0, %v864_v8, %v860_v12  ;;  %v1067_v8 = vld [vmem:[%s3291_s4 + $0x70] sm:$0xff]  ;;  %v1065_v12 = vld [vmem:[%s3291_s4 + $0x60] sm:$0xff]  ;;  %vm55_vm0 = vcmp.lt.s32.totalorder %v2556_v29, 32 }
 0x9e0   :  { %v891_v5 = vmul.f32 %v2201_v13, %v865_v36  ;;  %v890_v16 = vmul.f32 %v888_v9, %v865_v36  ;;  %v2205_v43 = vpop.eup %2204  ;;  %v1068_v9 = vld [vmem:[%s3291_s4 + $0x78] sm:$0xff]  ;;  %1083 = vmatpush.msra.mxu2 %v1067_v8  ;;  %v1066_v13 = vld [vmem:[%s3291_s4 + $0x68] sm:$0xff]  ;;  %v1063_v36 = vld [vmem:[%s3291_s4 + $0x50] sm:$0xff] }
 0x9e1   :  { %v873_v21 = vmul.f32 %v2205_v43, %v871_v20  ;;  %vm878_vm3 = vweird.f32 %v2205_v43  ;;  %1106 = vmatpush.msra.mxu3 %v1068_v9  ;;  %v1059_v20 = vld [vmem:[%s3291_s4 + $0x30] sm:$0xff] }
 0x9e2   :  { %893 = vrot.lane.b32.xlu0 %v891_v5, %s2317_s3  ;;  %vm879_vm5 = vmor %vm877_vm4, %vm878_vm3  ;;  %v1064_v5 = vld [vmem:[%s3291_s4 + $0x58] sm:$0xff]  ;;  %1084 = vmatpush.msra.mxu2 %v1065_v12  ;;  %vm1044_vm3 = vcmask 1041408   ;;  %vm1048_vm4 = vcmask 1045504   ;;  %v1023_v12 = vsel %vm55_vm0, %v2755_v54, %v2678_v25 }
 0x9e3   :  { %v874_v22 = vsub.f32 1.0, %v873_v21  ;;  %1107 = vmatpush.msra.mxu3 %v1066_v13 }
 0x9e4   :  { %1085 = vmatpush.msra.mxu2 %v1063_v36 }
 0x9e5   :  { %v875_v23 = vmul.f32 %v2205_v43, %v874_v22  ;;  %1108 = vmatpush.msra.mxu3 %v1064_v5  ;;  %v1057_v22 = vld [vmem:[%s3291_s4 + $0x20] sm:$0xff] }
 0x9e7   :  { %v876_v28 = vadd.f32 %v2205_v43, %v875_v23  ;;  %1109 = vmatpush.msra.mxu3 %v1062_v17  ;;  %v1058_v23 = vld [vmem:[%s3291_s4 + $0x28] sm:$0xff] }
 0x9e9   :  { %v880_v38 = vsel %vm879_vm5, %v2205_v43, %v876_v28  ;;  %v1060_v43 = vld [vmem:[%s3291_s4 + $0x38] sm:$0xff]  ;;  %vm1046_vm5 = vcmask 1043456  }
 0x9ea   :  { %v885_v40 = vsel %vm882_vm6, %v884_v39, %v880_v38  ;;  %1110 = vmatpush.msra.mxu3 %v1060_v43 }
 0x9ec   :  { %1111 = vmatpush.msra.mxu3 %v1058_v23 }
 0xa54   :  { %v894_v24 = vpop.permute.xlu0 %893 }
 0xa55   :  { %v896_v51 = vadd.f32 %v894_v24, %v890_v16  ;;  %v1061_v16 = vld [vmem:[%s3291_s4 + $0x40] sm:$0xff] }
 0xa56   :  { %1086 = vmatpush.msra.mxu2 %v1061_v16 }
 0xa57   :  { %2206 = vtanh.f32 %v896_v51  ;;  %v995_v15 = vrot.slane %v896_v51, 6 }
 0xa58   :  { %1087 = vmatpush.msra.mxu2 %v1059_v20 }
 0xa5a   :  { %1088 = vmatpush.msra.mxu2 %v1057_v22 }
 0xa5d   :  { %v2207_v61 = vpop.eup %2206 }
 0xa5e   :  { %v898_v37 = vmul.f32 %v2207_v61, %v885_v40 }
 0xa60   :  { %v900_v41 = vrot.slane %v898_v37, 4 }
 0xa62   :  { %901 = vrot.lane.b32.xlu1 %v900_v41, %s2317_s3 }
 0xad4   :  { %v2767_v42 = vpop.permute.xlu1 %901 }
 0xad5   :  { %2084 = vmatmul.msk.f32.vlgmr.msra.gmra.mxu0 %vm144_vm11, %v2767_v42  ;;  %2085 = vmatmul.msk.f32.vlgmr.msra.gmra.mxu1 %vm144_vm11, %v2767_v42  ;;  %v1024_v36 = vsel %vm55_vm0, %v2767_v42, %v2646_v63 }
 0xb52   :  { %v922_v44 = vpop.f32.mrf.mxu0  ;;  %v942_v31 = vpop.f32.mrf.mxu1 }
 0xb53   :  { %v947_v46 = vrot.slane %v922_v44, 2  ;;  %v948_v57 = vrot.slane %v942_v31, 2  ;;  %v1054_v31 = vld [vmem:[%s3291_s4 + $0x8] sm:$0xff] }
 0xb55   :  { %v951_v47 = vadd.f32 %v947_v46, %v2741_v0  ;;  %v952_v59 = vadd.f32 %v948_v57, %v2749_v27  ;;  %v2840_v57 = vld [vmem:[%s3292_s5 + $0x60] sm:$0xff] }
 0xb57   :  { %v953_v49 = vadd.f32 %v951_v47, %v2569_v35  ;;  %v954_v62 = vadd.f32 %v952_v59, %v2594_v52  ;;  %v1055_v47 = vld [vmem:[%s3291_s4 + $0x10] sm:$0xff]  ;;  %v2847_v59 = vld [vmem:[%s3292_s5 + $0x68] sm:$0xff] }
 0xb58   :  { %1089 = vmatpush.msra.mxu2 %v1055_v47 }
 0xb59   :  { %v2086_v50 = vmul.f32 -1.442695, %v953_v49  ;;  %v2087_v52 = vmul.f32 -1.442695, %v954_v62  ;;  %v1056_v49 = vld [vmem:[%s3291_s4 + $0x18] sm:$0xff] }
 0xb5a   :  { %1112 = vmatpush.msra.mxu3 %v1056_v49 }
 0xb5b   :  { %2208 = vpow2.f32 %v2086_v50  ;;  %v1053_v50 = vld [vmem:[%s3291_s4] sm:$0xff] }
 0xb5c   :  { %1090 = vmatpush.msra.mxu2 %v1053_v50  ;;  %1113 = vmatpush.msra.mxu3 %v1054_v31 }
 0xb61   :  { %v2209_v55 = vpop.eup %2208 }
 0xb62   :  { %v958_v56 = vadd.f32 1.0, %v2209_v55  ;;  %v2830_v55 = vld [vmem:[%s3292_s5 + $0x70] sm:$0xff] }
 0xb63   :  { %1154 = vmatpush.msrb.mxu0 %v2830_v55  ;;  %1262 = vmatpush.msrb.mxu2 %v2830_v55 }
 0xb64   :  { %2210 = vrcp.f32 %v958_v56  ;;  %v970_v10 = vand.u32 2147483648, %v958_v56  ;;  %v968_v0 = vand.u32 2147483647, %v958_v56  ;;  %vm964_vm8 = vweird.f32 %v958_v56 }
 0xb65   :  { %2212 = vtanh.f32 %v954_v62  ;;  %v2857_v62 = vld [vmem:[%s3292_s5 + $0x58] sm:$0xff]  ;;  %1155 = vmatpush.msrb.mxu0 %v2840_v57  ;;  %1263 = vmatpush.msrb.mxu2 %v2840_v57 }
 0xb66   :  { %v971_v14 = vor.u32 1.1754944e-38, %v970_v10  ;;  %vm969_vm10 = vcmp.eq.f32.partialorder %v968_v0, 8.507059e+37  ;;  %2214 = vpow2.f32 %v2087_v52  ;;  %v2882_v10 = vld [vmem:[%s3292_s5 + $0x30] sm:$0xff]  ;;  %v2894_v0 = vld [vmem:[%s3292_s5 + $0x20] sm:$0xff] }
 0xb6a   :  { %v2211_v60 = vpop.eup %2210 }
 0xb6b   :  { %v960_v53 = vmul.f32 %v2211_v60, %v958_v56  ;;  %vm965_vm7 = vweird.f32 %v2211_v60  ;;  %v2213_v1 = vpop.eup %2212  ;;  %v2835_v56 = vld [vmem:[%s3292_s5 + $0x78] sm:$0xff] }
 0xb6c   :  { %vm966_vm9 = vmor %vm964_vm8, %vm965_vm7  ;;  %v2215_v7 = vpop.eup %2214  ;;  %1174 = vmatpush.msrb.mxu1 %v2835_v56  ;;  %1282 = vmatpush.msrb.mxu3 %v2835_v56 }
 0xb6d   :  { %v961_v6 = vsub.f32 1.0, %v960_v53  ;;  %v978_v4 = vadd.f32 1.0, %v2215_v7  ;;  %v2872_v53 = vld [vmem:[%s3292_s5 + $0x40] sm:$0xff] }
 0xb6e   :  { %1175 = vmatpush.msrb.mxu1 %v2847_v59  ;;  %1283 = vmatpush.msrb.mxu3 %v2847_v59 }
 0xb6f   :  { %v962_v11 = vmul.f32 %v2211_v60, %v961_v6  ;;  %2216 = vrcp.f32 %v978_v4  ;;  %v990_v38 = vand.u32 2147483648, %v978_v4  ;;  %vm984_vm13 = vweird.f32 %v978_v4  ;;  %v2877_v6 = vld [vmem:[%s3292_s5 + $0x48] sm:$0xff] }
 0xb70   :  { %v988_v39 = vand.u32 2147483647, %v978_v4  ;;  %1176 = vmatpush.msrb.mxu1 %v2857_v62  ;;  %1284 = vmatpush.msrb.mxu3 %v2857_v62 }
 0xb71   :  { %v963_v35 = vadd.f32 %v2211_v60, %v962_v11  ;;  %v991_v40 = vor.u32 1.1754944e-38, %v990_v38  ;;  %v2889_v11 = vld [vmem:[%s3292_s5 + $0x38] sm:$0xff] }
 0xb72   :  { %vm989_vm15 = vcmp.eq.f32.partialorder %v988_v39, 8.507059e+37  ;;  %1177 = vmatpush.msrb.mxu1 %v2877_v6  ;;  %1285 = vmatpush.msrb.mxu3 %v2877_v6 }
 0xb73   :  { %v967_v18 = vsel %vm966_vm9, %v2211_v60, %v963_v35  ;;  %v2852_v60 = vld [vmem:[%s3292_s5 + $0x50] sm:$0xff]  ;;  %v2899_v35 = vld [vmem:[%s3292_s5 + $0x28] sm:$0xff] }
 0xb74   :  { %v972_v30 = vsel %vm969_vm10, %v971_v14, %v967_v18  ;;  %1156 = vmatpush.msrb.mxu0 %v2852_v60  ;;  %1264 = vmatpush.msrb.mxu2 %v2852_v60  ;;  %v2908_v14 = vld [vmem:[%s3292_s5 + $0x10] sm:$0xff]  ;;  %v2922_v18 = vld [vmem:[%s3292_s5] sm:$0xff] }
 0xb75   :  { %v998_v27 = vmul.f32 %v2213_v1, %v972_v30  ;;  %v997_v2 = vmul.f32 %v995_v15, %v972_v30  ;;  %v2217_v19 = vpop.eup %2216  ;;  %1178 = vmatpush.msrb.mxu1 %v2889_v11  ;;  %v2913_v15 = vld [vmem:[%s3292_s5 + $0x18] sm:$0xff]  ;;  %1286 = vmatpush.msrb.mxu3 %v2889_v11  ;;  %v2927_v1 = vld [vmem:[%s3292_s5 + $0x8] sm:$0xff]  ;;  %v1015_v30 = vsel %vm55_vm0, %v2646_v63, %v2767_v42 }
 0xb76   :  { %v980_v21 = vmul.f32 %v2217_v19, %v978_v4  ;;  %vm985_vm12 = vweird.f32 %v2217_v19  ;;  %1157 = vmatpush.msrb.mxu0 %v2872_v53  ;;  %1265 = vmatpush.msrb.mxu2 %v2872_v53 }
 0xb77   :  { %1000 = vrot.lane.b32.xlu2 %v998_v27, %s2317_s3  ;;  %vm986_vm14 = vmor %vm984_vm13, %vm985_vm12  ;;  %1179 = vmatpush.msrb.mxu1 %v2899_v35  ;;  %v1021_v27 = vsel %vm55_vm0, %v2707_v3, %v2731_v58 }
 0xb78   :  { %v981_v24 = vsub.f32 1.0, %v980_v21  ;;  %1158 = vmatpush.msrb.mxu0 %v2882_v10  ;;  %1266 = vmatpush.msrb.mxu2 %v2882_v10  ;;  %v1033_v8 = vrot.slane %v1021_v27, 2 }
 0xb79   :  { %1287 = vmatpush.msrb.mxu3 %v2899_v35  ;;  %1180 = vmatpush.msrb.mxu1 %v2913_v15 }
 0xb7a   :  { %v982_v51 = vmul.f32 %v2217_v19, %v981_v24  ;;  %1159 = vmatpush.msrb.mxu0 %v2894_v0  ;;  %1267 = vmatpush.msrb.mxu2 %v2894_v0 }
 0xb7b   :  { %1288 = vmatpush.msrb.mxu3 %v2913_v15  ;;  %1181 = vmatpush.msrb.mxu1 %v2927_v1 }
 0xb7c   :  { %v983_v33 = vadd.f32 %v2217_v19, %v982_v51  ;;  %1160 = vmatpush.msrb.mxu0 %v2908_v14  ;;  %1268 = vmatpush.msrb.mxu2 %v2908_v14 }
 0xb7d   :  { %1182 = vmatmul.f32.vlgmr.msrb.gmra.mxu1 %v2316_v26  ;;  %1289 = vmatpush.msrb.mxu3 %v2927_v1 }
 0xb7e   :  { %v987_v61 = vsel %vm986_vm14, %v2217_v19, %v983_v33  ;;  %1161 = vmatpush.msrb.mxu0 %v2922_v18  ;;  %1269 = vmatpush.msrb.mxu2 %v2922_v18 }
 0xb7f   :  { %v992_v41 = vsel %vm989_vm15, %v991_v40, %v987_v61  ;;  %1162 = vmatmul.f32.vlgmr.msrb.gmra.mxu0 %v2316_v26  ;;  %1389 = vmatpush.msra.mxu1 %v2835_v56  ;;  %v1018_v26 = vsel %vm55_vm0, %v2678_v25, %v2755_v54  ;;  %v1036_v25 = vrot.slane %v1023_v12, 6  ;;  %v1039_v54 = vrot.slane %v1024_v36, 4 }
 0xb80   :  { %1369 = vmatpush.msra.mxu0 %v2830_v55  ;;  %v1030_v7 = vrot.slane %v1018_v26, 4 }
 0xb81   :  { %1390 = vmatpush.msra.mxu1 %v2847_v59 }
 0xb82   :  { %1370 = vmatpush.msra.mxu0 %v2840_v57 }
 0xb83   :  { %1391 = vmatpush.msra.mxu1 %v2857_v62 }
 0xb84   :  { %1371 = vmatpush.msra.mxu0 %v2852_v60 }
 0xb85   :  { %1392 = vmatpush.msra.mxu1 %v2877_v6 }
 0xb86   :  { %1372 = vmatpush.msra.mxu0 %v2872_v53 }
 0xb87   :  { %1393 = vmatpush.msra.mxu1 %v2889_v11 }
 0xb88   :  { %1373 = vmatpush.msra.mxu0 %v2882_v10 }
 0xb89   :  { %1394 = vmatpush.msra.mxu1 %v2899_v35 }
 0xb8a   :  { %1374 = vmatpush.msra.mxu0 %v2894_v0 }
 0xb8b   :  { %1395 = vmatpush.msra.mxu1 %v2913_v15 }
 0xb8c   :  { %1375 = vmatpush.msra.mxu0 %v2908_v14 }
 0xb8d   :  { %1396 = vmatpush.msra.mxu1 %v2927_v1 }
 0xb8e   :  { %1376 = vmatpush.msra.mxu0 %v2922_v18 }
 0xb8f   :  { %1611 = vmatpush.msrb.mxu1 %v2835_v56 }
 0xb90   :  { %1591 = vmatpush.msrb.mxu0 %v2830_v55 }
 0xb91   :  { %1612 = vmatpush.msrb.mxu1 %v2847_v59 }
 0xb92   :  { %1592 = vmatpush.msrb.mxu0 %v2840_v57 }
 0xb93   :  { %1613 = vmatpush.msrb.mxu1 %v2857_v62 }
 0xb94   :  { %1593 = vmatpush.msrb.mxu0 %v2852_v60 }
 0xb95   :  { %1614 = vmatpush.msrb.mxu1 %v2877_v6 }
 0xb96   :  { %1594 = vmatpush.msrb.mxu0 %v2872_v53 }
 0xb97   :  { %1615 = vmatpush.msrb.mxu1 %v2889_v11 }
 0xb98   :  { %1595 = vmatpush.msrb.mxu0 %v2882_v10 }
 0xb99   :  { %1616 = vmatpush.msrb.mxu1 %v2899_v35 }
 0xb9a   :  { %1596 = vmatpush.msrb.mxu0 %v2894_v0 }
 0xb9b   :  { %1617 = vmatpush.msrb.mxu1 %v2913_v15 }
 0xb9c   :  { %1597 = vmatpush.msrb.mxu0 %v2908_v14 }
 0xb9d   :  { %1618 = vmatpush.msrb.mxu1 %v2927_v1 }
 0xb9e   :  { %1598 = vmatpush.msrb.mxu0 %v2922_v18 }
 0xbd1   :  { %v1001_v28 = vpop.permute.xlu2 %1000 }
 0xbd2   :  { %v1003_v32 = vadd.f32 %v1001_v28, %v997_v2  ;;  %v1027_v2 = vrot.slane %v1015_v30, 6 }
 0xbd4   :  { %2218 = vtanh.f32 %v1003_v32 }
 0xbda   :  { %v2219_v37 = vpop.eup %2218 }
 0xbdb   :  { %v1005_v44 = vmul.f32 %v2219_v37, %v992_v41 }
 0xbdd   :  { %v1008_v46 = vrot.slane %v1005_v44, 6 }
 0xbdf   :  { %1009 = vrot.lane.b32.xlu0 %v1008_v46, %s2317_s3 }
 0xbfa   :  { %v1183_v37 = vpop.f32.mrf.mxu1 }
 0xbfc   :  { %v1163_v22 = vpop.f32.mrf.mxu0 }
 0xc51   :  { %v1010_v52 = vpop.permute.xlu0 %1009 }
 0xc52   :  { %v1012_v4 = vsel %vm55_vm0, %v2602_v45, %v1010_v52  ;;  %v1025_v16 = vsel %vm55_vm0, %v1010_v52, %v2602_v45  ;;  %v1022_v45 = vsel %vm55_vm0, %v2731_v58, %v2707_v3  ;;  %v1137_v58 = vld [vmem:[%s3293_s6] sm:$0x3] }
 0xc53   :  { %v1045_v9 = vsel %vm1044_vm3, %v1012_v4, %v1027_v2  ;;  %v1042_v63 = vrot.slane %v1025_v16, 2  ;;  %v1050_v42 = vsel %vm1044_vm3, %v1022_v45, %v1036_v25  ;;  %v3040_v23 = vperm.slane %v1137_v58, 0 }
 0xc54   :  { %v1047_v13 = vsel %vm1046_vm5, %v1045_v9, %v1030_v7  ;;  %v1051_v17 = vsel %vm1046_vm5, %v1050_v42, %v1039_v54  ;;  %v3058_v44 = vperm.slane %v1137_v58, 1 }
 0xc55   :  { %v1049_v5 = vsel %vm1048_vm4, %v1047_v13, %v1033_v8  ;;  %v1052_v19 = vsel %vm1048_vm4, %v1051_v17, %v1042_v63 }
 0xc56   :  { %2088 = vmatmul.msk.f32.vlgmr.msra.gmra.mxu2 %vm144_vm11, %v1049_v5  ;;  %2090 = vmatmul.msk.f32.vlgmr.msra.gmra.mxu3 %vm144_vm11, %v1049_v5 }
 0xc57   :  { %1476 = vmatpush.msra.mxu2 %v2830_v55  ;;  %1496 = vmatpush.msra.mxu3 %v2835_v56 }
 0xc59   :  { %1477 = vmatpush.msra.mxu2 %v2840_v57  ;;  %1497 = vmatpush.msra.mxu3 %v2847_v59 }
 0xc5b   :  { %1478 = vmatpush.msra.mxu2 %v2852_v60  ;;  %1498 = vmatpush.msra.mxu3 %v2857_v62 }
 0xc5d   :  { %1479 = vmatpush.msra.mxu2 %v2872_v53  ;;  %1499 = vmatpush.msra.mxu3 %v2877_v6 }
 0xc5e   :  { %2089 = vmatmul.msk.f32.gmra.mxu2 %vm144_vm11, %v1052_v19  ;;  %2091 = vmatmul.msk.f32.gmra.mxu3 %vm144_vm11, %v1052_v19 }
 0xc5f   :  { %1480 = vmatpush.msra.mxu2 %v2882_v10  ;;  %1500 = vmatpush.msra.mxu3 %v2889_v11 }
 0xc61   :  { %1481 = vmatpush.msra.mxu2 %v2894_v0  ;;  %1501 = vmatpush.msra.mxu3 %v2899_v35 }
 0xc63   :  { %1482 = vmatpush.msra.mxu2 %v2908_v14  ;;  %1502 = vmatpush.msra.mxu3 %v2913_v15 }
 0xc65   :  { %1483 = vmatpush.msra.mxu2 %v2922_v18  ;;  %1503 = vmatpush.msra.mxu3 %v2927_v1 }
 0xcd9   :  { %v3030_v3 = vpop.f32.mrf.mxu2  ;;  %v3037_v43 = vpop.f32.mrf.mxu3 }
 0xce1   :  { %v3035_v20 = vpop.f32.mrf.mxu2  ;;  %v3049_v33 = vpop.f32.mrf.mxu3 }
 0xce2   :  { %v1140_v21 = vrot.slane %v3035_v20, 6  ;;  %v1141_v38 = vrot.slane %v3049_v33, 6 }
 0xce4   :  { %v3045_v24 = vsel %vm2565_vm1, %v3030_v3, %v1140_v21  ;;  %v3055_v40 = vsel %vm2584_vm2, %v3037_v43, %v1141_v38  ;;  %v1243_v38 = vrot.slane %v3035_v20, 2 }
 0xce5   :  { %v1186_v51 = vadd.f32 %v1163_v22, %v3045_v24  ;;  %v1187_v41 = vadd.f32 %v1183_v37, %v3055_v40 }
 0xce6   :  { %v3092_v37 = vsel %vm2565_vm1, %v3030_v3, %v1243_v38 }
 0xce7   :  { %v1193_v28 = vadd.f32 %v3040_v23, %v1186_v51  ;;  %v1194_v47 = vadd.f32 %v3058_v44, %v1187_v41 }
 0xce9   :  { %v2092_v32 = vmul.f32 -1.442695, %v1193_v28  ;;  %v2093_v9 = vmul.f32 -1.442695, %v1194_v47 }
 0xceb   :  { %2220 = vpow2.f32 %v2092_v32 }
 0xcf1   :  { %v2221_v39 = vpop.eup %2220 }
 0xcf2   :  { %v1198_v61 = vadd.f32 1.0, %v2221_v39 }
 0xcf4   :  { %2222 = vrcp.f32 %v1198_v61  ;;  %v1210_v31 = vand.u32 2147483648, %v1198_v61  ;;  %v1208_v26 = vand.u32 2147483647, %v1198_v61  ;;  %vm1204_vm7 = vweird.f32 %v1198_v61 }
 0xcf5   :  { %2224 = vtanh.f32 %v1194_v47 }
 0xcf6   :  { %v1211_v2 = vor.u32 1.1754944e-38, %v1210_v31  ;;  %vm1209_vm9 = vcmp.eq.f32.partialorder %v1208_v26, 8.507059e+37  ;;  %2226 = vpow2.f32 %v2093_v9  ;;  %v1244_v31 = vrot.slane %v3049_v33, 2 }
 0xcfa   :  { %v2223_v46 = vpop.eup %2222 }
 0xcfb   :  { %v1200_v49 = vmul.f32 %v2223_v46, %v1198_v61  ;;  %vm1205_vm6 = vweird.f32 %v2223_v46  ;;  %v2225_v7 = vpop.eup %2224 }
 0xcfc   :  { %vm1206_vm8 = vmor %vm1204_vm7, %vm1205_vm6  ;;  %v2227_v12 = vpop.eup %2226 }
 0xcfd   :  { %v1201_v50 = vsub.f32 1.0, %v1200_v49  ;;  %v1218_v13 = vadd.f32 1.0, %v2227_v12 }
 0xcff   :  { %v1202_v30 = vmul.f32 %v2223_v46, %v1201_v50  ;;  %2228 = vrcp.f32 %v1218_v13  ;;  %v1230_v17 = vand.u32 2147483648, %v1218_v13  ;;  %vm1224_vm12 = vweird.f32 %v1218_v13 }
 0xd00   :  { %v1228_v19 = vand.u32 2147483647, %v1218_v13 }
 0xd01   :  { %v1203_v27 = vadd.f32 %v2223_v46, %v1202_v30  ;;  %v1231_v21 = vor.u32 1.1754944e-38, %v1230_v17 }
 0xd02   :  { %vm1229_vm14 = vcmp.eq.f32.partialorder %v1228_v19, 8.507059e+37 }
 0xd03   :  { %v1207_v52 = vsel %vm1206_vm8, %v2223_v46, %v1203_v27  ;;  %v3100_v27 = vsel %vm2584_vm2, %v3037_v43, %v1244_v31 }
 0xd04   :  { %v1212_v4 = vsel %vm1209_vm9, %v1211_v2, %v1207_v52 }
 0xd05   :  { %v1235_v8 = vmul.f32 %v2225_v7, %v1212_v4  ;;  %v2229_v36 = vpop.eup %2228  ;;  %v1234_v54 = vmul.f32 0.0, %v1212_v4 }
 0xd06   :  { %v1220_v5 = vmul.f32 %v2229_v36, %v1218_v13  ;;  %vm1225_vm10 = vweird.f32 %v2229_v36 }
 0xd07   :  { %1237 = vrot.lane.b32.xlu1 %v1235_v8, %s2317_s3  ;;  %vm1226_vm13 = vmor %vm1224_vm12, %vm1225_vm10 }
 0xd08   :  { %v1221_v16 = vsub.f32 1.0, %v1220_v5 }
 0xd0a   :  { %v1222_v25 = vmul.f32 %v2229_v36, %v1221_v16 }
 0xd0c   :  { %v1223_v42 = vadd.f32 %v2229_v36, %v1222_v25 }
 0xd0e   :  { %v1227_v58 = vsel %vm1226_vm13, %v2229_v36, %v1223_v42 }
 0xd0f   :  { %v1232_v51 = vsel %vm1229_vm14, %v1231_v21, %v1227_v58 }
 0xd79   :  { %v1238_v63 = vpop.permute.xlu1 %1237 }
 0xd7a   :  { %v3062_v45 = vadd.f32 %v1238_v63, %v1234_v54 }
 0xd7c   :  { %2230 = vtanh.f32 %v3062_v45  ;;  %v1344_v16 = vrot.slane %v3062_v45, 6 }
 0xd82   :  { %v2231_v22 = vpop.eup %2230 }
 0xd83   :  { %v1242_v28 = vmul.f32 %v2231_v22, %v1232_v51 }
 0xd85   :  { %1250 = vrot.lane.b32.xlu2 %v1242_v28, %s2317_s3 }
 0xddf   :  { %v3066_v32 = vpop.permute.xlu2 %1250 }
 0xde0   :  { %2094 = vmatmul.msk.f32.vlgmr.msrb.gmra.mxu2 %vm144_vm11, %v3066_v32  ;;  %2095 = vmatmul.msk.f32.vlgmr.msrb.gmra.mxu3 %vm144_vm11, %v3066_v32 }
 0xde1   :  { %1697 = vmatpush.msrb.mxu2 %v2830_v55  ;;  %1717 = vmatpush.msrb.mxu3 %v2835_v56 }
 0xde3   :  { %1698 = vmatpush.msrb.mxu2 %v2840_v57  ;;  %1718 = vmatpush.msrb.mxu3 %v2847_v59 }
 0xde5   :  { %1699 = vmatpush.msrb.mxu2 %v2852_v60  ;;  %1719 = vmatpush.msrb.mxu3 %v2857_v62 }
 0xde7   :  { %1700 = vmatpush.msrb.mxu2 %v2872_v53  ;;  %1720 = vmatpush.msrb.mxu3 %v2877_v6 }
 0xde9   :  { %1701 = vmatpush.msrb.mxu2 %v2882_v10  ;;  %1721 = vmatpush.msrb.mxu3 %v2889_v11 }
 0xdeb   :  { %1702 = vmatpush.msrb.mxu2 %v2894_v0  ;;  %1722 = vmatpush.msrb.mxu3 %v2899_v35 }
 0xded   :  { %1703 = vmatpush.msrb.mxu2 %v2908_v14  ;;  %1723 = vmatpush.msrb.mxu3 %v2913_v15 }
 0xdef   :  { %1704 = vmatpush.msrb.mxu2 %v2922_v18  ;;  %1724 = vmatpush.msrb.mxu3 %v2927_v1 }
 0xe63   :  { %v1271_v39 = vpop.f32.mrf.mxu2  ;;  %v1291_v49 = vpop.f32.mrf.mxu3 }
 0xe64   :  { %v1296_v61 = vrot.slane %v1271_v39, 6  ;;  %v1297_v26 = vrot.slane %v1291_v49, 6 }
 0xe66   :  { %v1300_v41 = vadd.f32 %v1296_v61, %v3092_v37  ;;  %v1301_v2 = vadd.f32 %v1297_v26, %v3100_v27 }
 0xe68   :  { %v1302_v46 = vadd.f32 %v1300_v41, %v3040_v23  ;;  %v1303_v7 = vadd.f32 %v1301_v2, %v3058_v44 }
 0xe6a   :  { %v2096_v47 = vmul.f32 -1.442695, %v1302_v46  ;;  %v2097_v19 = vmul.f32 -1.442695, %v1303_v7 }
 0xe6c   :  { %2232 = vpow2.f32 %v2096_v47 }
 0xe72   :  { %v2233_v50 = vpop.eup %2232 }
 0xe73   :  { %v1307_v30 = vadd.f32 1.0, %v2233_v50 }
 0xe75   :  { %2234 = vrcp.f32 %v1307_v30  ;;  %v1319_v9 = vand.u32 2147483648, %v1307_v30  ;;  %v1317_v13 = vand.u32 2147483647, %v1307_v30  ;;  %vm1313_vm6 = vweird.f32 %v1307_v30 }
 0xe76   :  { %2236 = vtanh.f32 %v1303_v7 }
 0xe77   :  { %v1320_v5 = vor.u32 1.1754944e-38, %v1319_v9  ;;  %vm1318_vm8 = vcmp.eq.f32.partialorder %v1317_v13, 8.507059e+37  ;;  %2238 = vpow2.f32 %v2097_v19 }
 0xe7b   :  { %v2235_v52 = vpop.eup %2234 }
 0xe7c   :  { %v1309_v4 = vmul.f32 %v2235_v52, %v1307_v30  ;;  %vm1314_vm15 = vweird.f32 %v2235_v52  ;;  %v2237_v54 = vpop.eup %2236 }
 0xe7d   :  { %vm1315_vm7 = vmor %vm1313_vm6, %vm1314_vm15  ;;  %v2239_v58 = vpop.eup %2238 }
 0xe7e   :  { %v1310_v8 = vsub.f32 1.0, %v1309_v4  ;;  %v1327_v21 = vadd.f32 1.0, %v2239_v58 }
 0xe80   :  { %v1311_v12 = vmul.f32 %v2235_v52, %v1310_v8  ;;  %2240 = vrcp.f32 %v1327_v21  ;;  %v1339_v41 = vand.u32 2147483648, %v1327_v21  ;;  %vm1333_vm10 = vweird.f32 %v1327_v21 }
 0xe81   :  { %v1337_v46 = vand.u32 2147483647, %v1327_v21 }
 0xe82   :  { %v1312_v36 = vadd.f32 %v2235_v52, %v1311_v12  ;;  %v1340_v49 = vor.u32 1.1754944e-38, %v1339_v41 }
 0xe83   :  { %vm1338_vm13 = vcmp.eq.f32.partialorder %v1337_v46, 8.507059e+37 }
 0xe84   :  { %v1316_v25 = vsel %vm1315_vm7, %v2235_v52, %v1312_v36 }
 0xe85   :  { %v1321_v63 = vsel %vm1318_vm8, %v1320_v5, %v1316_v25 }
 0xe86   :  { %v1347_v42 = vmul.f32 %v2237_v54, %v1321_v63  ;;  %v1346_v17 = vmul.f32 %v1344_v16, %v1321_v63  ;;  %v2241_v22 = vpop.eup %2240 }
 0xe87   :  { %v1329_v51 = vmul.f32 %v2241_v22, %v1327_v21  ;;  %vm1334_vm9 = vweird.f32 %v2241_v22 }
 0xe88   :  { %1349 = vrot.lane.b32.xlu0 %v1347_v42, %s2317_s3  ;;  %vm1335_vm12 = vmor %vm1333_vm10, %vm1334_vm9 }
 0xe89   :  { %v1330_v28 = vsub.f32 1.0, %v1329_v51 }
 0xe8b   :  { %v1331_v38 = vmul.f32 %v2241_v22, %v1330_v28 }
 0xe8d   :  { %v1332_v45 = vadd.f32 %v2241_v22, %v1331_v38 }
 0xe8f   :  { %v1336_v47 = vsel %vm1335_vm12, %v2241_v22, %v1332_v45 }
 0xe90   :  { %v1341_v31 = vsel %vm1338_vm13, %v1340_v49, %v1336_v47 }
 0xefa   :  { %v1350_v39 = vpop.permute.xlu0 %1349 }
 0xefb   :  { %v3106_v61 = vadd.f32 %v1350_v39, %v1346_v17 }
 0xefd   :  { %2242 = vtanh.f32 %v3106_v61  ;;  %v1451_v22 = vrot.slane %v3106_v61, 6 }
 0xf03   :  { %v2243_v50 = vpop.eup %2242 }
 0xf04   :  { %v1354_v30 = vmul.f32 %v2243_v50, %v1341_v31 }
 0xf06   :  { %v1356_v26 = vrot.slane %v1354_v30, 2 }
 0xf08   :  { %1357 = vrot.lane.b32.xlu1 %v1356_v26, %s2317_s3 }
 0xf7a   :  { %v3110_v2 = vpop.permute.xlu1 %1357 }
 0xf7b   :  { %2098 = vmatmul.msk.f32.vlgmr.msra.gmra.mxu0 %vm144_vm11, %v3110_v2  ;;  %2099 = vmatmul.msk.f32.vlgmr.msra.gmra.mxu1 %vm144_vm11, %v3110_v2 }
 0xf7c   :  { %1804 = vmatpush.msra.mxu0 %v2830_v55  ;;  %1824 = vmatpush.msra.mxu1 %v2835_v56 }
 0xf7e   :  { %1805 = vmatpush.msra.mxu0 %v2840_v57  ;;  %1825 = vmatpush.msra.mxu1 %v2847_v59 }
 0xf80   :  { %1806 = vmatpush.msra.mxu0 %v2852_v60  ;;  %1826 = vmatpush.msra.mxu1 %v2857_v62 }
 0xf82   :  { %1807 = vmatpush.msra.mxu0 %v2872_v53  ;;  %1827 = vmatpush.msra.mxu1 %v2877_v6 }
 0xf84   :  { %1808 = vmatpush.msra.mxu0 %v2882_v10  ;;  %1828 = vmatpush.msra.mxu1 %v2889_v11 }
 0xf86   :  { %1809 = vmatpush.msra.mxu0 %v2894_v0  ;;  %1829 = vmatpush.msra.mxu1 %v2899_v35 }
 0xf88   :  { %1810 = vmatpush.msra.mxu0 %v2908_v14  ;;  %1830 = vmatpush.msra.mxu1 %v2913_v15 }
 0xf8a   :  { %1811 = vmatpush.msra.mxu0 %v2922_v18  ;;  %1831 = vmatpush.msra.mxu1 %v2927_v1 }
 0xff8   :  { %v1378_v52 = vpop.f32.mrf.mxu0  ;;  %v1398_v12 = vpop.f32.mrf.mxu1 }
 0xff9   :  { %v1403_v7 = vrot.slane %v1378_v52, 4  ;;  %v1404_v5 = vrot.slane %v1398_v12, 4 }
 0xffb   :  { %v1407_v4 = vadd.f32 %v1403_v7, %v3045_v24  ;;  %v1408_v16 = vadd.f32 %v1404_v5, %v3055_v40 }
 0xffd   :  { %v1409_v8 = vadd.f32 %v1407_v4, %v3040_v23  ;;  %v1410_v54 = vadd.f32 %v1408_v16, %v3058_v44 }
 0xfff   :  { %v2100_v9 = vmul.f32 -1.442695, %v1409_v8  ;;  %v2101_v45 = vmul.f32 -1.442695, %v1410_v54 }
0x1001   :  { %2244 = vpow2.f32 %v2100_v9 }
0x1007   :  { %v2245_v13 = vpop.eup %2244 }
0x1008   :  { %v1414_v36 = vadd.f32 1.0, %v2245_v13 }
0x100a   :  { %2246 = vrcp.f32 %v1414_v36  ;;  %v1426_v17 = vand.u32 2147483648, %v1414_v36  ;;  %v1424_v24 = vand.u32 2147483647, %v1414_v36  ;;  %vm1420_vm15 = vweird.f32 %v1414_v36 }
0x100b   :  { %2248 = vtanh.f32 %v1410_v54 }
0x100c   :  { %v1427_v21 = vor.u32 1.1754944e-38, %v1426_v17  ;;  %vm1425_vm7 = vcmp.eq.f32.partialorder %v1424_v24, 8.507059e+37  ;;  %2250 = vpow2.f32 %v2101_v45 }
0x1010   :  { %v2247_v25 = vpop.eup %2246 }
0x1011   :  { %v1416_v63 = vmul.f32 %v2247_v25, %v1414_v36  ;;  %vm1421_vm14 = vweird.f32 %v2247_v25  ;;  %v2249_v28 = vpop.eup %2248 }
0x1012   :  { %vm1422_vm6 = vmor %vm1420_vm15, %vm1421_vm14  ;;  %v2251_v41 = vpop.eup %2250 }
0x1013   :  { %v1417_v42 = vsub.f32 1.0, %v1416_v63  ;;  %v1434_v46 = vadd.f32 1.0, %v2251_v41 }
0x1015   :  { %v1418_v19 = vmul.f32 %v2247_v25, %v1417_v42  ;;  %2252 = vrcp.f32 %v1434_v46  ;;  %v1446_v52 = vand.u32 2147483648, %v1434_v46  ;;  %vm1440_vm9 = vweird.f32 %v1434_v46 }
0x1016   :  { %v1444_v7 = vand.u32 2147483647, %v1434_v46 }
0x1017   :  { %v1419_v58 = vadd.f32 %v2247_v25, %v1418_v19  ;;  %v1447_v8 = vor.u32 1.1754944e-38, %v1446_v52  ;;  %v1571_v52 = vrot.slane %v3030_v3, 6 }
0x1018   :  { %vm1445_vm12 = vcmp.eq.f32.partialorder %v1444_v7, 8.507059e+37 }
0x1019   :  { %v1423_v51 = vsel %vm1422_vm6, %v2247_v25, %v1419_v58  ;;  %v3181_v7 = vsel %vm2565_vm1, %v3035_v20, %v1571_v52 }
0x101a   :  { %v1428_v40 = vsel %vm1425_vm7, %v1427_v21, %v1423_v51 }
0x101b   :  { %v1454_v38 = vmul.f32 %v2249_v28, %v1428_v40  ;;  %v1453_v39 = vmul.f32 %v1451_v22, %v1428_v40  ;;  %v2253_v47 = vpop.eup %2252 }
0x101c   :  { %v1436_v49 = vmul.f32 %v2253_v47, %v1434_v46  ;;  %vm1441_vm8 = vweird.f32 %v2253_v47 }
0x101d   :  { %1456 = vrot.lane.b32.xlu2 %v1454_v38, %s2317_s3  ;;  %vm1442_vm10 = vmor %vm1440_vm9, %vm1441_vm8 }
0x101e   :  { %v1437_v50 = vsub.f32 1.0, %v1436_v49 }
0x1020   :  { %v1438_v31 = vmul.f32 %v2253_v47, %v1437_v50 }
0x1022   :  { %v1439_v61 = vadd.f32 %v2253_v47, %v1438_v31 }
0x1024   :  { %v1443_v4 = vsel %vm1442_vm10, %v2253_v47, %v1439_v61 }
0x1025   :  { %v1448_v12 = vsel %vm1445_vm12, %v1447_v8, %v1443_v4 }
0x1077   :  { %v1457_v30 = vpop.permute.xlu2 %1456 }
0x1078   :  { %v3138_v26 = vadd.f32 %v1457_v30, %v1453_v39 }
0x107a   :  { %2254 = vtanh.f32 %v3138_v26  ;;  %v1558_v54 = vrot.slane %v3138_v26, 6 }
0x1080   :  { %v2255_v9 = vpop.eup %2254 }
0x1081   :  { %v1461_v13 = vmul.f32 %v2255_v9, %v1448_v12 }
0x1083   :  { %v1463_v36 = vrot.slane %v1461_v13, 4 }
0x1085   :  { %1464 = vrot.lane.b32.xlu0 %v1463_v36, %s2317_s3 }
0x10f7   :  { %v3142_v5 = vpop.permute.xlu0 %1464 }
0x10f8   :  { %2102 = vmatmul.msk.f32.vlgmr.msra.gmra.mxu2 %vm144_vm11, %v3142_v5  ;;  %2103 = vmatmul.msk.f32.vlgmr.msra.gmra.mxu3 %vm144_vm11, %v3142_v5 }
0x10f9   :  { %1911 = vmatpush.msra.mxu2 %v2830_v55  ;;  %1931 = vmatpush.msra.mxu3 %v2835_v56 }
0x10fb   :  { %1912 = vmatpush.msra.mxu2 %v2840_v57  ;;  %1932 = vmatpush.msra.mxu3 %v2847_v59 }
0x10fd   :  { %1913 = vmatpush.msra.mxu2 %v2852_v60  ;;  %1933 = vmatpush.msra.mxu3 %v2857_v62 }
0x10ff   :  { %1914 = vmatpush.msra.mxu2 %v2872_v53  ;;  %1934 = vmatpush.msra.mxu3 %v2877_v6 }
0x1101   :  { %1915 = vmatpush.msra.mxu2 %v2882_v10  ;;  %1935 = vmatpush.msra.mxu3 %v2889_v11 }
0x1103   :  { %1916 = vmatpush.msra.mxu2 %v2894_v0  ;;  %1936 = vmatpush.msra.mxu3 %v2899_v35 }
0x1105   :  { %1917 = vmatpush.msra.mxu2 %v2908_v14  ;;  %1937 = vmatpush.msra.mxu3 %v2913_v15 }
0x1107   :  { %1918 = vmatpush.msra.mxu2 %v2922_v18  ;;  %1938 = vmatpush.msra.mxu3 %v2927_v1 }
0x117b   :  { %v1485_v55 = vpop.f32.mrf.mxu2  ;;  %v1505_v62 = vpop.f32.mrf.mxu3 }
0x117c   :  { %v1510_v56 = vrot.slane %v1485_v55, 2  ;;  %v1511_v10 = vrot.slane %v1505_v62, 2  ;;  %v1572_v55 = vrot.slane %v3037_v43, 6 }
0x117e   :  { %v1514_v57 = vadd.f32 %v1510_v56, %v3092_v37  ;;  %v1515_v11 = vadd.f32 %v1511_v10, %v3100_v27 }
0x1180   :  { %v1516_v59 = vadd.f32 %v1514_v57, %v3040_v23  ;;  %v1517_v35 = vadd.f32 %v1515_v11, %v3058_v44  ;;  %v3189_v57 = vsel %vm2584_vm2, %v3049_v33, %v1572_v55 }
0x1182   :  { %v2104_v60 = vmul.f32 -1.442695, %v1516_v59  ;;  %v2105_v24 = vmul.f32 -1.442695, %v1517_v35 }
0x1184   :  { %2256 = vpow2.f32 %v2104_v60 }
0x118a   :  { %v2257_v53 = vpop.eup %2256 }
0x118b   :  { %v1521_v6 = vadd.f32 1.0, %v2257_v53 }
0x118d   :  { %2258 = vrcp.f32 %v1521_v6  ;;  %v1533_v18 = vand.u32 2147483648, %v1521_v6  ;;  %v1531_v37 = vand.u32 2147483647, %v1521_v6  ;;  %vm1527_vm14 = vweird.f32 %v1521_v6 }
0x118e   :  { %2260 = vtanh.f32 %v1517_v35 }
0x118f   :  { %v1534_v25 = vor.u32 1.1754944e-38, %v1533_v18  ;;  %vm1532_vm6 = vcmp.eq.f32.partialorder %v1531_v37, 8.507059e+37  ;;  %2262 = vpow2.f32 %v2105_v24 }
0x1193   :  { %v2259_v0 = vpop.eup %2258 }
0x1194   :  { %v1523_v14 = vmul.f32 %v2259_v0, %v1521_v6  ;;  %vm1528_vm13 = vweird.f32 %v2259_v0  ;;  %v2261_v42 = vpop.eup %2260 }
0x1195   :  { %vm1529_vm15 = vmor %vm1527_vm14, %vm1528_vm13  ;;  %v2263_v58 = vpop.eup %2262 }
0x1196   :  { %v1524_v15 = vsub.f32 1.0, %v1523_v14  ;;  %v1541_v21 = vadd.f32 1.0, %v2263_v58 }
0x1198   :  { %v1525_v1 = vmul.f32 %v2259_v0, %v1524_v15  ;;  %2264 = vrcp.f32 %v1541_v21  ;;  %v1553_v41 = vand.u32 2147483648, %v1541_v21  ;;  %vm1547_vm8 = vweird.f32 %v1541_v21 }
0x1199   :  { %v1551_v46 = vand.u32 2147483647, %v1541_v21 }
0x119a   :  { %v1526_v16 = vadd.f32 %v2259_v0, %v1525_v1  ;;  %v1554_v49 = vor.u32 1.1754944e-38, %v1553_v41 }
0x119b   :  { %vm1552_vm10 = vcmp.eq.f32.partialorder %v1551_v46, 8.507059e+37 }
0x119c   :  { %v1530_v63 = vsel %vm1529_vm15, %v2259_v0, %v1526_v16 }
0x119d   :  { %v1535_v27 = vsel %vm1532_vm6, %v1534_v25, %v1530_v63 }
0x119e   :  { %v1561_v17 = vmul.f32 %v2261_v42, %v1535_v27  ;;  %v1560_v19 = vmul.f32 %v1558_v54, %v1535_v27  ;;  %v2265_v22 = vpop.eup %2264 }
0x119f   :  { %v1543_v51 = vmul.f32 %v2265_v22, %v1541_v21  ;;  %vm1548_vm7 = vweird.f32 %v2265_v22 }
0x11a0   :  { %1563 = vrot.lane.b32.xlu1 %v1561_v17, %s2317_s3  ;;  %vm1549_vm9 = vmor %vm1547_vm8, %vm1548_vm7 }
0x11a1   :  { %v1544_v28 = vsub.f32 1.0, %v1543_v51 }
0x11a3   :  { %v1545_v40 = vmul.f32 %v2265_v22, %v1544_v28 }
0x11a5   :  { %v1546_v45 = vadd.f32 %v2265_v22, %v1545_v40 }
0x11a7   :  { %v1550_v47 = vsel %vm1549_vm9, %v2265_v22, %v1546_v45 }
0x11a8   :  { %v1555_v31 = vsel %vm1552_vm10, %v1554_v49, %v1550_v47  ;;  %v1678_v47 = vrot.slane %v3030_v3, 2 }
0x1212   :  { %v1564_v38 = vpop.permute.xlu1 %1563 }
0x1213   :  { %v1566_v39 = vadd.f32 %v1564_v38, %v1560_v19 }
0x1215   :  { %2266 = vtanh.f32 %v1566_v39  ;;  %v1667_v15 = vrot.slane %v1566_v39, 6 }
0x121b   :  { %v2267_v50 = vpop.eup %2266 }
0x121c   :  { %v1568_v30 = vmul.f32 %v2267_v50, %v1555_v31  ;;  %v3205_v31 = vsel %vm2565_vm1, %v3035_v20, %v1678_v47 }
0x121e   :  { %v1578_v26 = vrot.slane %v1568_v30, 6 }
0x1220   :  { %1579 = vrot.lane.b32.xlu2 %v1578_v26, %s2317_s3 }
0x127a   :  { %v3171_v61 = vpop.permute.xlu2 %1579 }
0x127b   :  { %2106 = vmatmul.msk.f32.vlgmr.msrb.gmra.mxu0 %vm144_vm11, %v3171_v61  ;;  %2107 = vmatmul.msk.f32.vlgmr.msrb.gmra.mxu1 %vm144_vm11, %v3171_v61 }
0x12f8   :  { %v1600_v4 = vpop.f32.mrf.mxu0  ;;  %v1620_v56 = vpop.f32.mrf.mxu1 }
0x12f9   :  { %v1623_v8 = vadd.f32 %v1600_v4, %v3181_v7  ;;  %v1624_v59 = vadd.f32 %v1620_v56, %v3189_v57 }
0x12fb   :  { %v1625_v9 = vadd.f32 %v1623_v8, %v3040_v23  ;;  %v1626_v62 = vadd.f32 %v1624_v59, %v3058_v44 }
0x12fd   :  { %v2108_v12 = vmul.f32 -1.442695, %v1625_v9  ;;  %v2109_v54 = vmul.f32 -1.442695, %v1626_v62 }
0x12ff   :  { %2268 = vpow2.f32 %v2108_v12 }
0x1305   :  { %v2269_v13 = vpop.eup %2268 }
0x1306   :  { %v1630_v36 = vadd.f32 1.0, %v2269_v13  ;;  %v1679_v13 = vrot.slane %v3037_v43, 2 }
0x1308   :  { %2270 = vrcp.f32 %v1630_v36  ;;  %v1642_v10 = vand.u32 2147483648, %v1630_v36  ;;  %v1640_v0 = vand.u32 2147483647, %v1630_v36  ;;  %vm1636_vm13 = vweird.f32 %v1630_v36 }
0x1309   :  { %2272 = vtanh.f32 %v1626_v62  ;;  %v3213_v3 = vsel %vm2584_vm2, %v3049_v33, %v1679_v13 }
0x130a   :  { %v1643_v14 = vor.u32 1.1754944e-38, %v1642_v10  ;;  %vm1641_vm15 = vcmp.eq.f32.partialorder %v1640_v0, 8.507059e+37  ;;  %2274 = vpow2.f32 %v2109_v54 }
0x130e   :  { %v2271_v60 = vpop.eup %2270 }
0x130f   :  { %v1632_v53 = vmul.f32 %v2271_v60, %v1630_v36  ;;  %vm1637_vm12 = vweird.f32 %v2271_v60  ;;  %v2273_v1 = vpop.eup %2272 }
0x1310   :  { %vm1638_vm14 = vmor %vm1636_vm13, %vm1637_vm12  ;;  %v2275_v63 = vpop.eup %2274 }
0x1311   :  { %v1633_v6 = vsub.f32 1.0, %v1632_v53  ;;  %v1650_v42 = vadd.f32 1.0, %v2275_v63 }
0x1313   :  { %v1634_v11 = vmul.f32 %v2271_v60, %v1633_v6  ;;  %2276 = vrcp.f32 %v1650_v42  ;;  %v1662_v51 = vand.u32 2147483648, %v1650_v42  ;;  %vm1656_vm7 = vweird.f32 %v1650_v42 }
0x1314   :  { %v1660_v28 = vand.u32 2147483647, %v1650_v42 }
0x1315   :  { %v1635_v35 = vadd.f32 %v2271_v60, %v1634_v11  ;;  %v1663_v38 = vor.u32 1.1754944e-38, %v1662_v51 }
0x1316   :  { %vm1661_vm9 = vcmp.eq.f32.partialorder %v1660_v28, 8.507059e+37 }
0x1317   :  { %v1639_v18 = vsel %vm1638_vm14, %v2271_v60, %v1635_v35 }
0x1318   :  { %v1644_v37 = vsel %vm1641_vm15, %v1643_v14, %v1639_v18 }
0x1319   :  { %v1670_v16 = vmul.f32 %v2273_v1, %v1644_v37  ;;  %v1669_v25 = vmul.f32 %v1667_v15, %v1644_v37  ;;  %v2277_v27 = vpop.eup %2276 }
0x131a   :  { %v1652_v17 = vmul.f32 %v2277_v27, %v1650_v42  ;;  %vm1657_vm6 = vweird.f32 %v2277_v27 }
0x131b   :  { %1672 = vrot.lane.b32.xlu0 %v1670_v16, %s2317_s3  ;;  %vm1658_vm8 = vmor %vm1656_vm7, %vm1657_vm6 }
0x131c   :  { %v1653_v19 = vsub.f32 1.0, %v1652_v17 }
0x131e   :  { %v1654_v24 = vmul.f32 %v2277_v27, %v1653_v19 }
0x1320   :  { %v1655_v22 = vadd.f32 %v2277_v27, %v1654_v24 }
0x1322   :  { %v1659_v40 = vsel %vm1658_vm8, %v2277_v27, %v1655_v22 }
0x1323   :  { %v1664_v45 = vsel %vm1661_vm9, %v1663_v38, %v1659_v40 }
0x138d   :  { %v1673_v58 = vpop.permute.xlu0 %1672 }
0x138e   :  { %v1675_v21 = vadd.f32 %v1673_v58, %v1669_v25 }
0x1390   :  { %2278 = vtanh.f32 %v1675_v21  ;;  %v1779_v6 = vrot.slane %v1675_v21, 6 }
0x1396   :  { %v2279_v39 = vpop.eup %2278 }
0x1397   :  { %v1677_v41 = vmul.f32 %v2279_v39, %v1664_v45 }
0x1399   :  { %1685 = vrot.lane.b32.xlu1 %v1677_v41, %s2317_s3 }
0x140b   :  { %v3195_v46 = vpop.permute.xlu1 %1685 }
0x140c   :  { %2110 = vmatmul.msk.f32.vlgmr.msrb.gmra.mxu2 %vm144_vm11, %v3195_v46  ;;  %2111 = vmatmul.msk.f32.vlgmr.msrb.gmra.mxu3 %vm144_vm11, %v3195_v46 }
0x148f   :  { %v1706_v49 = vpop.f32.mrf.mxu2  ;;  %v1726_v4 = vpop.f32.mrf.mxu3 }
0x1490   :  { %v1731_v50 = vrot.slane %v1706_v49, 6  ;;  %v1732_v12 = vrot.slane %v1726_v4, 6 }
0x1492   :  { %v1735_v30 = vadd.f32 %v1731_v50, %v3205_v31  ;;  %v1736_v34 = vadd.f32 %v1732_v12, %v3213_v3 }
0x1494   :  { %v1737_v26 = vadd.f32 %v1735_v30, %v3040_v23  ;;  %v1738_v36 = vadd.f32 %v1736_v34, %v3058_v44 }
0x1496   :  { %v2112_v52 = vmul.f32 -1.442695, %v1737_v26  ;;  %v2113_v35 = vmul.f32 -1.442695, %v1738_v36 }
0x1498   :  { %2280 = vpow2.f32 %v2112_v52 }
0x149e   :  { %v2281_v8 = vpop.eup %2280 }
0x149f   :  { %v1742_v9 = vadd.f32 1.0, %v2281_v8 }
0x14a1   :  { %2282 = vrcp.f32 %v1742_v9  ;;  %v1754_v59 = vand.u32 2147483648, %v1742_v9  ;;  %v1752_v62 = vand.u32 2147483647, %v1742_v9  ;;  %vm1748_vm10 = vweird.f32 %v1742_v9 }
0x14a2   :  { %2284 = vtanh.f32 %v1738_v36 }
0x14a3   :  { %v1755_v43 = vor.u32 1.1754944e-38, %v1754_v59  ;;  %vm1753_vm2 = vcmp.eq.f32.partialorder %v1752_v62, 8.507059e+37  ;;  %2286 = vpow2.f32 %v2113_v35 }
0x14a7   :  { %v2283_v20 = vpop.eup %2282 }
0x14a8   :  { %v1744_v55 = vmul.f32 %v2283_v20, %v1742_v9  ;;  %vm1749_vm1 = vweird.f32 %v2283_v20  ;;  %v2285_v33 = vpop.eup %2284 }
0x14a9   :  { %vm1750_vm12 = vmor %vm1748_vm10, %vm1749_vm1  ;;  %v2287_v14 = vpop.eup %2286 }
0x14aa   :  { %v1745_v56 = vsub.f32 1.0, %v1744_v55  ;;  %v1762_v15 = vadd.f32 1.0, %v2287_v14 }
0x14ac   :  { %v1746_v60 = vmul.f32 %v2283_v20, %v1745_v56  ;;  %2288 = vrcp.f32 %v1762_v15  ;;  %v1774_v42 = vand.u32 2147483648, %v1762_v15  ;;  %vm1768_vm14 = vweird.f32 %v1762_v15 }
0x14ad   :  { %v1772_v27 = vand.u32 2147483647, %v1762_v15 }
0x14ae   :  { %v1747_v53 = vadd.f32 %v2283_v20, %v1746_v60  ;;  %v1775_v19 = vor.u32 1.1754944e-38, %v1774_v42 }
0x14af   :  { %vm1773_vm6 = vcmp.eq.f32.partialorder %v1772_v27, 8.507059e+37 }
0x14b0   :  { %v1751_v48 = vsel %vm1750_vm12, %v2283_v20, %v1747_v53 }
0x14b1   :  { %v1756_v10 = vsel %vm1753_vm2, %v1755_v43, %v1751_v48 }
0x14b2   :  { %v1782_v11 = vmul.f32 %v2285_v33, %v1756_v10  ;;  %v1781_v0 = vmul.f32 %v1779_v6, %v1756_v10  ;;  %v2289_v18 = vpop.eup %2288 }
0x14b3   :  { %v1764_v1 = vmul.f32 %v2289_v18, %v1762_v15  ;;  %vm1769_vm13 = vweird.f32 %v2289_v18 }
0x14b4   :  { %1784 = vrot.lane.b32.xlu2 %v1782_v11, %s2317_s3  ;;  %vm1770_vm15 = vmor %vm1768_vm14, %vm1769_vm13 }
0x14b5   :  { %v1765_v37 = vsub.f32 1.0, %v1764_v1 }
0x14b7   :  { %v1766_v16 = vmul.f32 %v2289_v18, %v1765_v37 }
0x14b9   :  { %v1767_v63 = vadd.f32 %v2289_v18, %v1766_v16 }
0x14bb   :  { %v1771_v17 = vsel %vm1770_vm15, %v2289_v18, %v1767_v63 }
0x14bc   :  { %v1776_v58 = vsel %vm1773_vm6, %v1775_v19, %v1771_v17 }
0x150e   :  { %v1785_v25 = vpop.permute.xlu2 %1784 }
0x150f   :  { %v1787_v54 = vadd.f32 %v1785_v25, %v1781_v0 }
0x1511   :  { %2290 = vtanh.f32 %v1787_v54  ;;  %v1886_v20 = vrot.slane %v1787_v54, 6 }
0x1517   :  { %v2291_v24 = vpop.eup %2290 }
0x1518   :  { %v1789_v21 = vmul.f32 %v2291_v24, %v1776_v58 }
0x151a   :  { %v1791_v22 = vrot.slane %v1789_v21, 2 }
0x151c   :  { %1792 = vrot.lane.b32.xlu0 %v1791_v22, %s2317_s3 }
0x158e   :  { %v3219_v51 = vpop.permute.xlu0 %1792 }
0x158f   :  { %2114 = vmatmul.msk.f32.vlgmr.msra.gmra.mxu0 %vm144_vm11, %v3219_v51  ;;  %2115 = vmatmul.msk.f32.vlgmr.msra.gmra.mxu1 %vm144_vm11, %v3219_v51 }
0x160c   :  { %v1813_v28 = vpop.f32.mrf.mxu0  ;;  %v1833_v41 = vpop.f32.mrf.mxu1 }
0x160d   :  { %v1838_v40 = vrot.slane %v1813_v28, 4  ;;  %v1839_v50 = vrot.slane %v1833_v41, 4 }
0x160f   :  { %v1842_v38 = vadd.f32 %v1838_v40, %v3181_v7  ;;  %v1843_v30 = vadd.f32 %v1839_v50, %v3189_v57 }
0x1611   :  { %v1844_v39 = vadd.f32 %v1842_v38, %v3040_v23  ;;  %v1845_v52 = vadd.f32 %v1843_v30, %v3058_v44 }
0x1613   :  { %v2116_v45 = vmul.f32 -1.442695, %v1844_v39  ;;  %v2117_v60 = vmul.f32 -1.442695, %v1845_v52 }
0x1615   :  { %2292 = vpow2.f32 %v2116_v45 }
0x161b   :  { %v2293_v47 = vpop.eup %2292 }
0x161c   :  { %v1849_v49 = vadd.f32 1.0, %v2293_v47 }
0x161e   :  { %2294 = vrcp.f32 %v1849_v49  ;;  %v1861_v9 = vand.u32 2147483648, %v1849_v49  ;;  %v1859_v7 = vand.u32 2147483647, %v1849_v49  ;;  %vm1855_vm8 = vweird.f32 %v1849_v49 }
0x161f   :  { %2296 = vtanh.f32 %v1845_v52 }
0x1620   :  { %v1862_v34 = vor.u32 1.1754944e-38, %v1861_v9  ;;  %vm1860_vm1 = vcmp.eq.f32.partialorder %v1859_v7, 8.507059e+37  ;;  %2298 = vpow2.f32 %v2117_v60 }
0x1624   :  { %v2295_v26 = vpop.eup %2294 }
0x1625   :  { %v1851_v4 = vmul.f32 %v2295_v26, %v1849_v49  ;;  %vm1856_vm7 = vweird.f32 %v2295_v26  ;;  %v2297_v55 = vpop.eup %2296 }
0x1626   :  { %vm1857_vm9 = vmor %vm1855_vm8, %vm1856_vm7  ;;  %v2299_v62 = vpop.eup %2298 }
0x1627   :  { %v1852_v8 = vsub.f32 1.0, %v1851_v4  ;;  %v1869_v53 = vadd.f32 1.0, %v2299_v62 }
0x1629   :  { %v1853_v12 = vmul.f32 %v2295_v26, %v1852_v8  ;;  %2300 = vrcp.f32 %v1869_v53  ;;  %v1881_v35 = vand.u32 2147483648, %v1869_v53  ;;  %vm1875_vm12 = vweird.f32 %v1869_v53 }
0x162a   :  { %v1879_v14 = vand.u32 2147483647, %v1869_v53 }
0x162b   :  { %v1854_v13 = vadd.f32 %v2295_v26, %v1853_v12  ;;  %v1882_v18 = vor.u32 1.1754944e-38, %v1881_v35  ;;  %v2019_v35 = vsel %vm55_vm0, %v3171_v61, %v3195_v46 }
0x162c   :  { %vm1880_vm13 = vcmp.eq.f32.partialorder %v1879_v14, 8.507059e+37 }
0x162d   :  { %v1858_v36 = vsel %vm1857_vm9, %v2295_v26, %v1854_v13 }
0x162e   :  { %v1863_v56 = vsel %vm1860_vm1, %v1862_v34, %v1858_v36 }
0x162f   :  { %v1889_v57 = vmul.f32 %v2297_v55, %v1863_v56  ;;  %v1888_v59 = vmul.f32 %v1886_v20, %v1863_v56  ;;  %v2301_v43 = vpop.eup %2300 }
0x1630   :  { %v1871_v6 = vmul.f32 %v2301_v43, %v1869_v53  ;;  %vm1876_vm10 = vweird.f32 %v2301_v43 }
0x1631   :  { %1891 = vrot.lane.b32.xlu1 %v1889_v57, %s2317_s3  ;;  %vm1877_vm2 = vmor %vm1875_vm12, %vm1876_vm10 }
0x1632   :  { %v1872_v48 = vsub.f32 1.0, %v1871_v6 }
0x1634   :  { %v1873_v33 = vmul.f32 %v2301_v43, %v1872_v48  ;;  %v2021_v48 = vsel %vm55_vm0, %v3219_v51, %v3142_v5 }
0x1636   :  { %v1874_v0 = vadd.f32 %v2301_v43, %v1873_v33 }
0x1638   :  { %v1878_v15 = vsel %vm1877_vm2, %v2301_v43, %v1874_v0  ;;  %v2034_v0 = vrot.slane %v2021_v48, 6 }
0x1639   :  { %v1883_v37 = vsel %vm1880_vm13, %v1882_v18, %v1878_v15 }
0x16a3   :  { %v1892_v10 = vpop.permute.xlu1 %1891 }
0x16a4   :  { %v1894_v11 = vadd.f32 %v1892_v10, %v1888_v59 }
0x16a6   :  { %2302 = vtanh.f32 %v1894_v11  ;;  %v1993_v50 = vrot.slane %v1894_v11, 6  ;;  %v2016_v11 = vsel %vm55_vm0, %v3142_v5, %v3219_v51  ;;  %v2031_v51 = vrot.slane %v2019_v35, 2 }
0x16ac   :  { %v2303_v1 = vpop.eup %2302 }
0x16ad   :  { %v1896_v16 = vmul.f32 %v2303_v1, %v1883_v37  ;;  %v2020_v1 = vsel %vm55_vm0, %v3195_v46, %v3171_v61 }
0x16af   :  { %v1898_v25 = vrot.slane %v1896_v16, 4  ;;  %v2045_v16 = vsel %vm1044_vm3, %v2020_v1, %v2034_v0 }
0x16b1   :  { %1899 = vrot.lane.b32.xlu2 %v1898_v25, %s2317_s3 }
0x170b   :  { %v3231_v54 = vpop.permute.xlu2 %1899 }
0x170c   :  { %2118 = vmatmul.msk.f32.vlgmr.msra.gmra.mxu2 %vm144_vm11, %v3231_v54  ;;  %2119 = vmatmul.msk.f32.vlgmr.msra.gmra.mxu3 %vm144_vm11, %v3231_v54  ;;  %v2022_v33 = vsel %vm55_vm0, %v3231_v54, %v3110_v2  ;;  %v2013_v10 = vsel %vm55_vm0, %v3110_v2, %v3231_v54  ;;  %v2028_v2 = vrot.slane %v2016_v11, 4 }
0x170d   :  { %v2037_v14 = vrot.slane %v2022_v33, 4  ;;  %v2025_v15 = vrot.slane %v2013_v10, 6 }
0x178f   :  { %v1920_v63 = vpop.f32.mrf.mxu2  ;;  %v1940_v24 = vpop.f32.mrf.mxu3 }
0x1790   :  { %v1945_v42 = vrot.slane %v1920_v63, 2  ;;  %v1946_v22 = vrot.slane %v1940_v24, 2  ;;  %v2046_v63 = vsel %vm1046_vm5, %v2045_v16, %v2037_v14 }
0x1792   :  { %v1949_v27 = vadd.f32 %v1945_v42, %v3205_v31  ;;  %v1950_v28 = vadd.f32 %v1946_v22, %v3213_v3 }
0x1794   :  { %v1951_v17 = vadd.f32 %v1949_v27, %v3040_v23  ;;  %v1952_v38 = vadd.f32 %v1950_v28, %v3058_v44 }
0x1796   :  { %v2120_v19 = vmul.f32 -1.442695, %v1951_v17  ;;  %v2121_v44 = vmul.f32 -1.442695, %v1952_v38 }
0x1798   :  { %2304 = vpow2.f32 %v2120_v19 }
0x179e   :  { %v2305_v58 = vpop.eup %2304 }
0x179f   :  { %v1956_v21 = vadd.f32 1.0, %v2305_v58 }
0x17a1   :  { %2306 = vrcp.f32 %v1956_v21  ;;  %v1968_v41 = vand.u32 2147483648, %v1956_v21  ;;  %v1966_v31 = vand.u32 2147483647, %v1956_v21  ;;  %vm1962_vm15 = vweird.f32 %v1956_v21 }
0x17a2   :  { %2308 = vtanh.f32 %v1952_v38 }
0x17a3   :  { %v1969_v49 = vor.u32 1.1754944e-38, %v1968_v41  ;;  %vm1967_vm7 = vcmp.eq.f32.partialorder %v1966_v31, 8.507059e+37  ;;  %2310 = vpow2.f32 %v2121_v44 }
0x17a7   :  { %v2307_v40 = vpop.eup %2306 }
0x17a8   :  { %v1958_v39 = vmul.f32 %v2307_v40, %v1956_v21  ;;  %vm1963_vm14 = vweird.f32 %v2307_v40  ;;  %v2309_v26 = vpop.eup %2308 }
0x17a9   :  { %vm1964_vm6 = vmor %vm1962_vm15, %vm1963_vm14  ;;  %v2311_v8 = vpop.eup %2310 }
0x17aa   :  { %v1959_v45 = vsub.f32 1.0, %v1958_v39  ;;  %v1976_v9 = vadd.f32 1.0, %v2311_v8 }
0x17ac   :  { %v1960_v47 = vmul.f32 %v2307_v40, %v1959_v45  ;;  %2312 = vrcp.f32 %v1976_v9  ;;  %v1988_v56 = vand.u32 2147483648, %v1976_v9  ;;  %vm1982_vm9 = vweird.f32 %v1976_v9 }
0x17ad   :  { %v1986_v57 = vand.u32 2147483647, %v1976_v9 }
0x17ae   :  { %v1961_v23 = vadd.f32 %v2307_v40, %v1960_v47  ;;  %v1989_v60 = vor.u32 1.1754944e-38, %v1988_v56 }
0x17af   :  { %vm1987_vm10 = vcmp.eq.f32.partialorder %v1986_v57, 8.507059e+37 }
0x17b0   :  { %v1965_v30 = vsel %vm1964_vm6, %v2307_v40, %v1961_v23 }
0x17b1   :  { %v1970_v52 = vsel %vm1967_vm7, %v1969_v49, %v1965_v30 }
0x17b2   :  { %v1996_v3 = vmul.f32 %v2309_v26, %v1970_v52  ;;  %v1995_v4 = vmul.f32 %v1993_v50, %v1970_v52  ;;  %v2313_v12 = vpop.eup %2312 }
0x17b3   :  { %v1978_v7 = vmul.f32 %v2313_v12, %v1976_v9  ;;  %vm1983_vm8 = vweird.f32 %v2313_v12 }
0x17b4   :  { %1998 = vrot.lane.b32.xlu0 %v1996_v3, %s2317_s3  ;;  %vm1984_vm1 = vmor %vm1982_vm9, %vm1983_vm8 }
0x17b5   :  { %v1979_v13 = vsub.f32 1.0, %v1978_v7 }
0x17b7   :  { %v1980_v34 = vmul.f32 %v2313_v12, %v1979_v13 }
0x17b9   :  { %v1981_v55 = vadd.f32 %v2313_v12, %v1980_v34 }
0x17bb   :  { %v1985_v59 = vsel %vm1984_vm1, %v2313_v12, %v1981_v55 }
0x17bc   :  { %v1990_v53 = vsel %vm1987_vm10, %v1989_v60, %v1985_v59 }
0x1826   :  { %v1999_v20 = vpop.permute.xlu0 %1998 }
0x1827   :  { %v2001_v36 = vadd.f32 %v1999_v20, %v1995_v4 }
0x1829   :  { %2314 = vtanh.f32 %v2001_v36 }
0x182f   :  { %v2315_v62 = vpop.eup %2314 }
0x1830   :  { %v2003_v43 = vmul.f32 %v2315_v62, %v1990_v53 }
0x1832   :  { %v2006_v6 = vrot.slane %v2003_v43, 6 }
0x1834   :  { %2007 = vrot.lane.b32.xlu1 %v2006_v6, %s2317_s3 }
0x18a6   :  { %v2008_v18 = vpop.permute.xlu1 %2007 }
0x18a7   :  { %v2010_v37 = vsel %vm55_vm0, %v3066_v32, %v2008_v18  ;;  %v2023_v5 = vsel %vm55_vm0, %v2008_v18, %v3066_v32 }
0x18a8   :  { %v2040_v25 = vrot.slane %v2023_v5, 2  ;;  %v2042_v54 = vsel %vm1044_vm3, %v2010_v37, %v2025_v15 }
0x18a9   :  { %v2043_v42 = vsel %vm1046_vm5, %v2042_v54, %v2028_v2 }
0x18aa   :  { %v2044_v61 = vsel %vm1048_vm4, %v2043_v42, %v2031_v51  ;;  %v2047_v46 = vsel %vm1048_vm4, %v2046_v63, %v2040_v25 }
0x18ab   :  { %2048 = vst.msk [vmem:[%s3294_s7] sm:$0xff] %vm144_vm11, %v2044_v61 }
0x18ac   :  { %2049 = vst.msk [vmem:[%s3294_s7 + $0x8] sm:$0xff] %vm144_vm11, %v2047_v46 }

</bundles_post_ra>
